<compile_context>
chip_gen: v7x
topology: tpu7x:2x2x1
jax: 0.10.0
libtpu: 0.0.40
codegen_flags: <defaults>
</compile_context>

<pallas_src>
import functools

import jax
import jax.numpy as jnp
from jax.experimental import pallas as pl
from jax.experimental.pallas import tpu as pltpu

N_FEATS = 64
REDUCTION = 16
KSIZE = 7
PAD = (KSIZE - 1) // 2
BN_EPS = 1e-5


def _se_plus_kernel(x_ref, w1t_ref, b1_ref, w2_ref, b2_ref, wmat_ref,
                    colmask_ref, dysel_ref, bn_ref, o_ref, *, W):
    # x_ref      : (C, H*W)     one batch element, lane-dense (batch squeezed)
    # w1t_ref    : (C, Cr)      conv1 1x1 weight, transposed
    # b1_ref     : (1, Cr)
    # w2_ref     : (C, Cr)      conv2 1x1 weight (out, in)
    # b2_ref     : (C, 1)
    # wmat_ref   : (8, 14)      7x7 conv weights, [ky, 2*kx + ch] (row 7 = 0)
    # colmask_ref: (7, H*W)     column-validity masks per kx offset
    # dysel_ref  : (7, 8, H*W)  one-hot(ky) x row-validity mask per ky offset
    # bn_ref     : (2,)  SMEM   [bn_scale, bn_shift] (eval-mode BN, folded)
    C, HW = x_ref.shape
    x = x_ref[...]

    # ---------------- channel attention (SE branch) ----------------
    # AdaptiveAvgPool2d(1): one cross-lane reduce over the flat spatial axis.
    pooled = jnp.sum(x, axis=1, keepdims=True) * (1.0 / float(HW))            # (C, 1)

    # 1x1 conv (C -> C//r) + ReLU  (tiny contraction; kept on the VPU)
    z1 = jnp.sum(w1t_ref[...] * pooled, axis=0, keepdims=True) + b1_ref[...]  # (1, Cr)
    z1 = jnp.maximum(z1, 0.0)

    # 1x1 conv (C//r -> C) + sigmoid
    z2 = jnp.sum(w2_ref[...] * z1, axis=1, keepdims=True) + b2_ref[...]       # (C, 1)
    cy = jax.nn.sigmoid(z2)                                                   # (C, 1)

    xs = x * cy                                                               # (C, HW)

    # ---------------- spatial attention (SpatialGate) ----------------
    # ChannelPool: max and mean over the channel (sublane) axis.
    cmax = jnp.max(xs, axis=0, keepdims=True)                                 # (1, HW)
    cmean = jnp.sum(xs, axis=0, keepdims=True) * (1.0 / float(C))             # (1, HW)

    # 7x7 conv (2 -> 1 channel, zero padding, no bias), shift-separable form.
    #
    # Stage 1 (column offsets): for each kx, lane-roll the pooled maps by the
    # column offset, zero the columns that fall outside the image, and rank-1
    # accumulate this offset's contribution to *all* 7 kernel rows at once:
    #   r[ky, p] += w[ch, ky, kx] * pool[ch, p + ox]
    # via an (8,1) x (1,HW) broadcast outer product.  Exact f32 on the VPU.
    r = jnp.zeros((8, HW), jnp.float32)
    for kx in range(KSIZE):
        ox = kx - PAD
        shift = (-ox) % HW
        if shift == 0:
            sm, sn = cmax, cmean
        else:
            sm = pltpu.roll(cmax, shift=shift, axis=1)
            sn = pltpu.roll(cmean, shift=shift, axis=1)
        cm = colmask_ref[kx:kx + 1, :]                                        # (1, HW)
        pm = sm * cm
        pn = sn * cm
        r = (r + wmat_ref[:, 2 * kx:2 * kx + 1] * pm
               + wmat_ref[:, 2 * kx + 1:2 * kx + 2] * pn)                     # (8, HW)

    # Stage 2 (row offsets): lane-roll the whole (8, HW) accumulator by each
    # row offset (a multiple of W along the flat axis), keep only the matching
    # kernel-row sublane (the one-hot selector already carries the row-validity
    # mask for zero padding), and reduce over sublanes.
    s = jnp.zeros((8, HW), jnp.float32)
    for ky in range(KSIZE):
        oy = ky - PAD
        shift = (-(oy * W)) % HW
        rr = r if shift == 0 else pltpu.roll(r, shift=shift, axis=1)
        s = s + rr * dysel_ref[ky]                                            # (8, HW)
    conv = jnp.sum(s, axis=0, keepdims=True)                                  # (1, HW)

    # BatchNorm2d(1) in eval mode (folded) + sigmoid
    scale = jax.nn.sigmoid(conv * bn_ref[0] + bn_ref[1])                      # (1, HW)

    o_ref[...] = (xs * scale).astype(o_ref.dtype)                             # lane-dense


@jax.jit
def se_plus_forward(x, w1t, b1, w2, b2, wsp, bn):
    N, C, H, W = x.shape
    Cr = w1t.shape[1]
    HW = H * W

    # Flatten spatial dims onto the lane axis (free, HBM-contiguous reshape).
    x_flat = x.reshape(N, C, HW)

    # 7x7 conv weights laid out as (ky, 2*kx + ch), padded to 8 rows so the
    # in-kernel accumulator is exactly one sublane-group tall.
    wmat = jnp.transpose(wsp.astype(jnp.float32), (1, 2, 0)).reshape(KSIZE, 2 * KSIZE)
    wmat = jnp.concatenate([wmat, jnp.zeros((1, 2 * KSIZE), jnp.float32)], axis=0)

    # Zero-padding validity masks / row selectors (computed once, resident in
    # VMEM across all grid steps via a constant index_map).
    lin = jnp.arange(HW, dtype=jnp.int32)
    row = lin // W
    col = lin % W
    offs = jnp.arange(KSIZE, dtype=jnp.int32) - PAD                           # -3..3
    colmask = ((col[None, :] + offs[:, None] >= 0) &
               (col[None, :] + offs[:, None] < W)).astype(jnp.float32)        # (7, HW)
    rowmask = ((row[None, :] + offs[:, None] >= 0) &
               (row[None, :] + offs[:, None] < H)).astype(jnp.float32)        # (7, HW)
    dysel = (jnp.eye(KSIZE, 8, dtype=jnp.float32)[:, :, None]
             * rowmask[:, None, :])                                           # (7, 8, HW)

    # TODO(synk): for large H*W feature maps, tile H in the grid (with a +-3
    # row halo) and/or set vmem_limit_bytes to stay within v7x's 64 MiB VMEM.
    out_flat = pl.pallas_call(
        functools.partial(_se_plus_kernel, W=W),
        out_shape=jax.ShapeDtypeStruct((N, C, HW), x.dtype),
        grid=(N,),
        in_specs=[
            pl.BlockSpec((None, C, HW), lambda n: (n, 0, 0)),
            pl.BlockSpec((C, Cr), lambda n: (0, 0)),
            pl.BlockSpec((1, Cr), lambda n: (0, 0)),
            pl.BlockSpec((C, Cr), lambda n: (0, 0)),
            pl.BlockSpec((C, 1), lambda n: (0, 0)),
            pl.BlockSpec((8, 2 * KSIZE), lambda n: (0, 0)),
            pl.BlockSpec((KSIZE, HW), lambda n: (0, 0)),
            pl.BlockSpec((KSIZE, 8, HW), lambda n: (0, 0, 0)),
            pl.BlockSpec(memory_space=pltpu.MemorySpace.SMEM),
        ],
        out_specs=pl.BlockSpec((None, C, HW), lambda n: (n, 0, 0)),
        compiler_params=pltpu.CompilerParams(
            dimension_semantics=("parallel",)),
    )(x_flat, w1t, b1, w2, b2, wmat, colmask, dysel, bn)
    return out_flat.reshape(N, C, H, W)


def se_plus_reference(x, w1t, b1, w2, b2, wsp, bn):
    """Pure-JAX reference mirroring the PyTorch forward (eval-mode BN)."""
    pooled = jnp.mean(x, axis=(2, 3))                             # (N, C)
    z1 = jax.nn.relu(pooled @ w1t + b1)                           # (N, Cr)
    z2 = z1 @ w2.T + b2[:, 0][None, :]                            # (N, C)
    cy = jax.nn.sigmoid(z2)[:, :, None, None]
    xs = x * cy
    cmax = jnp.max(xs, axis=1, keepdims=True)
    cmean = jnp.mean(xs, axis=1, keepdims=True)
    comp = jnp.concatenate([cmax, cmean], axis=1)                 # (N, 2, H, W)
    conv = jax.lax.conv_general_dilated(
        comp, wsp[None], window_strides=(1, 1),
        padding=[(PAD, PAD), (PAD, PAD)],
        dimension_numbers=("NCHW", "OIHW", "NCHW"))               # (N, 1, H, W)
    scale = jax.nn.sigmoid(conv * bn[0] + bn[1])
    return xs * scale


if __name__ == "__main__":
    key = jax.random.PRNGKey(0)
    kx_, k1, k2, k3, k4, k5 = jax.random.split(key, 6)

    N, C, H, W = 2, N_FEATS, 16, 16
    Cr = N_FEATS // REDUCTION

    x = jax.random.normal(kx_, (N, C, H, W), jnp.float32)

    # Deterministic synthetic parameters (shapes from SEPlusModule.__init__)
    w1t = 0.2 * jax.random.normal(k1, (C, Cr), jnp.float32)   # conv1 weight^T
    b1 = 0.1 * jax.random.normal(k2, (1, Cr), jnp.float32)    # conv1 bias
    w2 = 0.2 * jax.random.normal(k3, (C, Cr), jnp.float32)    # conv2 weight
    b2 = 0.1 * jax.random.normal(k4, (C, 1), jnp.float32)     # conv2 bias
    wsp = 0.2 * jax.random.normal(k5, (2, KSIZE, KSIZE), jnp.float32)  # 7x7

    # BatchNorm2d(1) defaults: gamma=1, beta=0, running_mean=0, running_var=1
    gamma, beta, rmean, rvar = 1.0, 0.0, 0.0, 1.0
    bn_scale = gamma / (rvar + BN_EPS) ** 0.5
    bn_shift = beta - rmean * bn_scale
    bn = jnp.array([bn_scale, bn_shift], jnp.float32)

    out = se_plus_forward(x, w1t, b1, w2, b2, wsp, bn)
    out = jax.block_until_ready(out)

    ref = se_plus_reference(x, w1t, b1, w2, b2, wsp, bn)
    assert out.shape == x.shape and out.dtype == x.dtype
    max_err = float(jnp.max(jnp.abs(out - ref)))
    assert jnp.allclose(out, ref, atol=1e-4, rtol=1e-4), f"max_err={max_err}"

    print("KERNEL_OK")
</pallas_src>

<mosaic_0001>
module attributes {stable_mosaic.version = 11 : i64} {
  func.func @_se_plus_kernel(%arg0: i32, %arg1: memref<1x64x256xf32, #tpu.memory_space<vmem>>, %arg2: memref<64x4xf32, #tpu.memory_space<vmem>>, %arg3: memref<1x4xf32, #tpu.memory_space<vmem>>, %arg4: memref<64x4xf32, #tpu.memory_space<vmem>>, %arg5: memref<64x1xf32, #tpu.memory_space<vmem>>, %arg6: memref<8x14xf32, #tpu.memory_space<vmem>>, %arg7: memref<7x256xf32, #tpu.memory_space<vmem>>, %arg8: memref<7x8x256xf32, #tpu.memory_space<vmem>>, %arg9: memref<2xf32, #tpu.memory_space<smem>>, %arg10: memref<1x64x256xf32, #tpu.memory_space<vmem>>) attributes {dimension_semantics = [#tpu.dimension_semantics<parallel>], iteration_bounds = array<i64: 2>, scalar_prefetch = 0 : i64, scratch_operands = 0 : i64, tpu.core_type = #tpu.core_type<tc>, window_params = [{transform_indices = @transform_0, window_bounds = array<i64: 1, 64, 256>}, {pipeline_mode = #tpu.pipeline_mode<synchronous>, transform_indices = @transform_1, window_bounds = array<i64: 64, 4>}, {pipeline_mode = #tpu.pipeline_mode<synchronous>, transform_indices = @transform_2, window_bounds = array<i64: 1, 4>}, {pipeline_mode = #tpu.pipeline_mode<synchronous>, transform_indices = @transform_3, window_bounds = array<i64: 64, 4>}, {pipeline_mode = #tpu.pipeline_mode<synchronous>, transform_indices = @transform_4, window_bounds = array<i64: 64, 1>}, {pipeline_mode = #tpu.pipeline_mode<synchronous>, transform_indices = @transform_5, window_bounds = array<i64: 8, 14>}, {pipeline_mode = #tpu.pipeline_mode<synchronous>, transform_indices = @transform_6, window_bounds = array<i64: 7, 256>}, {pipeline_mode = #tpu.pipeline_mode<synchronous>, transform_indices = @transform_7, window_bounds = array<i64: 7, 8, 256>}, {transform_indices = @transform_8, window_bounds = array<i64: 2>}, {transform_indices = @transform_9, window_bounds = array<i64: 1, 64, 256>}]} {
    %c0 = arith.constant 0 : index
    %c0_0 = arith.constant 0 : index
    %c0_1 = arith.constant 0 : index
    %0 = vector.load %arg1[%c0, %c0_0, %c0_1] : memref<1x64x256xf32, #tpu.memory_space<vmem>>, vector<1x64x256xf32>
    %1 = vector.shape_cast %0 : vector<1x64x256xf32> to vector<64x256xf32>
    %cst = arith.constant dense<0.000000e+00> : vector<64xf32>
    %2 = vector.multi_reduction <add>, %1, %cst [1] : vector<64x256xf32> to vector<64xf32>
    %3 = vector.shape_cast %2 : vector<64xf32> to vector<64x1xf32>
    %cst_2 = arith.constant 3.906250e-03 : f32
    %4 = vector.broadcast %cst_2 : f32 to vector<64x1xf32>
    %5 = arith.mulf %3, %4 : vector<64x1xf32>
    %c0_3 = arith.constant 0 : index
    %c0_4 = arith.constant 0 : index
    %6 = vector.load %arg2[%c0_3, %c0_4] : memref<64x4xf32, #tpu.memory_space<vmem>>, vector<64x4xf32>
    %7 = vector.broadcast %5 : vector<64x1xf32> to vector<64x4xf32>
    %8 = arith.mulf %6, %7 : vector<64x4xf32>
    %cst_5 = arith.constant dense<0.000000e+00> : vector<4xf32>
    %9 = vector.multi_reduction <add>, %8, %cst_5 [0] : vector<64x4xf32> to vector<4xf32>
    %10 = vector.shape_cast %9 : vector<4xf32> to vector<1x4xf32>
    %c0_6 = arith.constant 0 : index
    %c0_7 = arith.constant 0 : index
    %11 = vector.load %arg3[%c0_6, %c0_7] : memref<1x4xf32, #tpu.memory_space<vmem>>, vector<1x4xf32>
    %12 = arith.addf %10, %11 : vector<1x4xf32>
    %cst_8 = arith.constant 0.000000e+00 : f32
    %13 = vector.broadcast %cst_8 : f32 to vector<1x4xf32>
    %14 = arith.maximumf %12, %13 : vector<1x4xf32>
    %c0_9 = arith.constant 0 : index
    %c0_10 = arith.constant 0 : index
    %15 = vector.load %arg4[%c0_9, %c0_10] : memref<64x4xf32, #tpu.memory_space<vmem>>, vector<64x4xf32>
    %16 = vector.broadcast %14 : vector<1x4xf32> to vector<64x4xf32>
    %17 = arith.mulf %15, %16 : vector<64x4xf32>
    %cst_11 = arith.constant dense<0.000000e+00> : vector<64xf32>
    %18 = vector.multi_reduction <add>, %17, %cst_11 [1] : vector<64x4xf32> to vector<64xf32>
    %19 = vector.shape_cast %18 : vector<64xf32> to vector<64x1xf32>
    %c0_12 = arith.constant 0 : index
    %c0_13 = arith.constant 0 : index
    %20 = vector.load %arg5[%c0_12, %c0_13] : memref<64x1xf32, #tpu.memory_space<vmem>>, vector<64x1xf32>
    %21 = arith.addf %19, %20 : vector<64x1xf32>
    %22 = arith.negf %21 : vector<64x1xf32>
    %23 = math.exp %22 : vector<64x1xf32>
    %cst_14 = arith.constant 1.000000e+00 : f32
    %24 = vector.broadcast %cst_14 : f32 to vector<64x1xf32>
    %25 = arith.addf %24, %23 : vector<64x1xf32>
    %26 = arith.divf %24, %25 : vector<64x1xf32>
    %27 = vector.broadcast %26 : vector<64x1xf32> to vector<64x256xf32>
    %28 = arith.mulf %1, %27 : vector<64x256xf32>
    %cst_15 = arith.constant dense<0xFF800000> : vector<256xf32>
    %29 = vector.multi_reduction <maximumf>, %28, %cst_15 [0] : vector<64x256xf32> to vector<256xf32>
    %30 = vector.shape_cast %29 : vector<256xf32> to vector<1x256xf32>
    %cst_16 = arith.constant dense<0.000000e+00> : vector<256xf32>
    %31 = vector.multi_reduction <add>, %28, %cst_16 [0] : vector<64x256xf32> to vector<256xf32>
    %32 = vector.shape_cast %31 : vector<256xf32> to vector<1x256xf32>
    %cst_17 = arith.constant 1.562500e-02 : f32
    %33 = vector.broadcast %cst_17 : f32 to vector<1x256xf32>
    %34 = arith.mulf %32, %33 : vector<1x256xf32>
    %cst_18 = arith.constant 0.000000e+00 : f32
    %35 = vector.broadcast %cst_18 : f32 to vector<8x256xf32>
    %c3_i32 = arith.constant 3 : i32
    %36 = tpu.dynamic_rotate %30 by %c3_i32 dim 1 : vector<1x256xf32>, i32 -> vector<1x256xf32>
    %c3_i32_19 = arith.constant 3 : i32
    %37 = tpu.dynamic_rotate %34 by %c3_i32_19 dim 1 : vector<1x256xf32>, i32 -> vector<1x256xf32>
    %c0_20 = arith.constant 0 : index
    %c0_21 = arith.constant 0 : index
    %38 = vector.load %arg7[%c0_20, %c0_21] : memref<7x256xf32, #tpu.memory_space<vmem>>, vector<1x256xf32>
    %39 = arith.mulf %36, %38 : vector<1x256xf32>
    %40 = arith.mulf %37, %38 : vector<1x256xf32>
    %c0_22 = arith.constant 0 : index
    %c0_23 = arith.constant 0 : index
    %41 = vector.load %arg6[%c0_22, %c0_23] : memref<8x14xf32, #tpu.memory_space<vmem>>, vector<8x1xf32>
    %42 = vector.broadcast %41 : vector<8x1xf32> to vector<8x256xf32>
    %43 = vector.broadcast %39 : vector<1x256xf32> to vector<8x256xf32>
    %44 = arith.mulf %42, %43 : vector<8x256xf32>
    %45 = arith.addf %35, %44 : vector<8x256xf32>
    %c0_24 = arith.constant 0 : index
    %c1 = arith.constant 1 : index
    %46 = vector.load %arg6[%c0_24, %c1] : memref<8x14xf32, #tpu.memory_space<vmem>>, vector<8x1xf32>
    %47 = vector.broadcast %46 : vector<8x1xf32> to vector<8x256xf32>
    %48 = vector.broadcast %40 : vector<1x256xf32> to vector<8x256xf32>
    %49 = arith.mulf %47, %48 : vector<8x256xf32>
    %50 = arith.addf %45, %49 : vector<8x256xf32>
    %c2_i32 = arith.constant 2 : i32
    %51 = tpu.dynamic_rotate %30 by %c2_i32 dim 1 : vector<1x256xf32>, i32 -> vector<1x256xf32>
    %c2_i32_25 = arith.constant 2 : i32
    %52 = tpu.dynamic_rotate %34 by %c2_i32_25 dim 1 : vector<1x256xf32>, i32 -> vector<1x256xf32>
    %c1_26 = arith.constant 1 : index
    %c0_27 = arith.constant 0 : index
    %53 = vector.load %arg7[%c1_26, %c0_27] : memref<7x256xf32, #tpu.memory_space<vmem>>, vector<1x256xf32>
    %54 = arith.mulf %51, %53 : vector<1x256xf32>
    %55 = arith.mulf %52, %53 : vector<1x256xf32>
    %c0_28 = arith.constant 0 : index
    %c2 = arith.constant 2 : index
    %56 = vector.load %arg6[%c0_28, %c2] : memref<8x14xf32, #tpu.memory_space<vmem>>, vector<8x1xf32>
    %57 = vector.broadcast %56 : vector<8x1xf32> to vector<8x256xf32>
    %58 = vector.broadcast %54 : vector<1x256xf32> to vector<8x256xf32>
    %59 = arith.mulf %57, %58 : vector<8x256xf32>
    %60 = arith.addf %50, %59 : vector<8x256xf32>
    %c0_29 = arith.constant 0 : index
    %c3 = arith.constant 3 : index
    %61 = vector.load %arg6[%c0_29, %c3] : memref<8x14xf32, #tpu.memory_space<vmem>>, vector<8x1xf32>
    %62 = vector.broadcast %61 : vector<8x1xf32> to vector<8x256xf32>
    %63 = vector.broadcast %55 : vector<1x256xf32> to vector<8x256xf32>
    %64 = arith.mulf %62, %63 : vector<8x256xf32>
    %65 = arith.addf %60, %64 : vector<8x256xf32>
    %c1_i32 = arith.constant 1 : i32
    %66 = tpu.dynamic_rotate %30 by %c1_i32 dim 1 : vector<1x256xf32>, i32 -> vector<1x256xf32>
    %c1_i32_30 = arith.constant 1 : i32
    %67 = tpu.dynamic_rotate %34 by %c1_i32_30 dim 1 : vector<1x256xf32>, i32 -> vector<1x256xf32>
    %c2_31 = arith.constant 2 : index
    %c0_32 = arith.constant 0 : index
    %68 = vector.load %arg7[%c2_31, %c0_32] : memref<7x256xf32, #tpu.memory_space<vmem>>, vector<1x256xf32>
    %69 = arith.mulf %66, %68 : vector<1x256xf32>
    %70 = arith.mulf %67, %68 : vector<1x256xf32>
    %c0_33 = arith.constant 0 : index
    %c4 = arith.constant 4 : index
    %71 = vector.load %arg6[%c0_33, %c4] : memref<8x14xf32, #tpu.memory_space<vmem>>, vector<8x1xf32>
    %72 = vector.broadcast %71 : vector<8x1xf32> to vector<8x256xf32>
    %73 = vector.broadcast %69 : vector<1x256xf32> to vector<8x256xf32>
    %74 = arith.mulf %72, %73 : vector<8x256xf32>
    %75 = arith.addf %65, %74 : vector<8x256xf32>
    %c0_34 = arith.constant 0 : index
    %c5 = arith.constant 5 : index
    %76 = vector.load %arg6[%c0_34, %c5] : memref<8x14xf32, #tpu.memory_space<vmem>>, vector<8x1xf32>
    %77 = vector.broadcast %76 : vector<8x1xf32> to vector<8x256xf32>
    %78 = vector.broadcast %70 : vector<1x256xf32> to vector<8x256xf32>
    %79 = arith.mulf %77, %78 : vector<8x256xf32>
    %80 = arith.addf %75, %79 : vector<8x256xf32>
    %c3_35 = arith.constant 3 : index
    %c0_36 = arith.constant 0 : index
    %81 = vector.load %arg7[%c3_35, %c0_36] : memref<7x256xf32, #tpu.memory_space<vmem>>, vector<1x256xf32>
    %82 = arith.mulf %30, %81 : vector<1x256xf32>
    %83 = arith.mulf %34, %81 : vector<1x256xf32>
    %c0_37 = arith.constant 0 : index
    %c6 = arith.constant 6 : index
    %84 = vector.load %arg6[%c0_37, %c6] : memref<8x14xf32, #tpu.memory_space<vmem>>, vector<8x1xf32>
    %85 = vector.broadcast %84 : vector<8x1xf32> to vector<8x256xf32>
    %86 = vector.broadcast %82 : vector<1x256xf32> to vector<8x256xf32>
    %87 = arith.mulf %85, %86 : vector<8x256xf32>
    %88 = arith.addf %80, %87 : vector<8x256xf32>
    %c0_38 = arith.constant 0 : index
    %c7 = arith.constant 7 : index
    %89 = vector.load %arg6[%c0_38, %c7] : memref<8x14xf32, #tpu.memory_space<vmem>>, vector<8x1xf32>
    %90 = vector.broadcast %89 : vector<8x1xf32> to vector<8x256xf32>
    %91 = vector.broadcast %83 : vector<1x256xf32> to vector<8x256xf32>
    %92 = arith.mulf %90, %91 : vector<8x256xf32>
    %93 = arith.addf %88, %92 : vector<8x256xf32>
    %c255_i32 = arith.constant 255 : i32
    %94 = tpu.dynamic_rotate %30 by %c255_i32 dim 1 : vector<1x256xf32>, i32 -> vector<1x256xf32>
    %c255_i32_39 = arith.constant 255 : i32
    %95 = tpu.dynamic_rotate %34 by %c255_i32_39 dim 1 : vector<1x256xf32>, i32 -> vector<1x256xf32>
    %c4_40 = arith.constant 4 : index
    %c0_41 = arith.constant 0 : index
    %96 = vector.load %arg7[%c4_40, %c0_41] : memref<7x256xf32, #tpu.memory_space<vmem>>, vector<1x256xf32>
    %97 = arith.mulf %94, %96 : vector<1x256xf32>
    %98 = arith.mulf %95, %96 : vector<1x256xf32>
    %c0_42 = arith.constant 0 : index
    %c8 = arith.constant 8 : index
    %99 = vector.load %arg6[%c0_42, %c8] : memref<8x14xf32, #tpu.memory_space<vmem>>, vector<8x1xf32>
    %100 = vector.broadcast %99 : vector<8x1xf32> to vector<8x256xf32>
    %101 = vector.broadcast %97 : vector<1x256xf32> to vector<8x256xf32>
    %102 = arith.mulf %100, %101 : vector<8x256xf32>
    %103 = arith.addf %93, %102 : vector<8x256xf32>
    %c0_43 = arith.constant 0 : index
    %c9 = arith.constant 9 : index
    %104 = vector.load %arg6[%c0_43, %c9] : memref<8x14xf32, #tpu.memory_space<vmem>>, vector<8x1xf32>
    %105 = vector.broadcast %104 : vector<8x1xf32> to vector<8x256xf32>
    %106 = vector.broadcast %98 : vector<1x256xf32> to vector<8x256xf32>
    %107 = arith.mulf %105, %106 : vector<8x256xf32>
    %108 = arith.addf %103, %107 : vector<8x256xf32>
    %c254_i32 = arith.constant 254 : i32
    %109 = tpu.dynamic_rotate %30 by %c254_i32 dim 1 : vector<1x256xf32>, i32 -> vector<1x256xf32>
    %c254_i32_44 = arith.constant 254 : i32
    %110 = tpu.dynamic_rotate %34 by %c254_i32_44 dim 1 : vector<1x256xf32>, i32 -> vector<1x256xf32>
    %c5_45 = arith.constant 5 : index
    %c0_46 = arith.constant 0 : index
    %111 = vector.load %arg7[%c5_45, %c0_46] : memref<7x256xf32, #tpu.memory_space<vmem>>, vector<1x256xf32>
    %112 = arith.mulf %109, %111 : vector<1x256xf32>
    %113 = arith.mulf %110, %111 : vector<1x256xf32>
    %c0_47 = arith.constant 0 : index
    %c10 = arith.constant 10 : index
    %114 = vector.load %arg6[%c0_47, %c10] : memref<8x14xf32, #tpu.memory_space<vmem>>, vector<8x1xf32>
    %115 = vector.broadcast %114 : vector<8x1xf32> to vector<8x256xf32>
    %116 = vector.broadcast %112 : vector<1x256xf32> to vector<8x256xf32>
    %117 = arith.mulf %115, %116 : vector<8x256xf32>
    %118 = arith.addf %108, %117 : vector<8x256xf32>
    %c0_48 = arith.constant 0 : index
    %c11 = arith.constant 11 : index
    %119 = vector.load %arg6[%c0_48, %c11] : memref<8x14xf32, #tpu.memory_space<vmem>>, vector<8x1xf32>
    %120 = vector.broadcast %119 : vector<8x1xf32> to vector<8x256xf32>
    %121 = vector.broadcast %113 : vector<1x256xf32> to vector<8x256xf32>
    %122 = arith.mulf %120, %121 : vector<8x256xf32>
    %123 = arith.addf %118, %122 : vector<8x256xf32>
    %c253_i32 = arith.constant 253 : i32
    %124 = tpu.dynamic_rotate %30 by %c253_i32 dim 1 : vector<1x256xf32>, i32 -> vector<1x256xf32>
    %c253_i32_49 = arith.constant 253 : i32
    %125 = tpu.dynamic_rotate %34 by %c253_i32_49 dim 1 : vector<1x256xf32>, i32 -> vector<1x256xf32>
    %c6_50 = arith.constant 6 : index
    %c0_51 = arith.constant 0 : index
    %126 = vector.load %arg7[%c6_50, %c0_51] : memref<7x256xf32, #tpu.memory_space<vmem>>, vector<1x256xf32>
    %127 = arith.mulf %124, %126 : vector<1x256xf32>
    %128 = arith.mulf %125, %126 : vector<1x256xf32>
    %c0_52 = arith.constant 0 : index
    %c12 = arith.constant 12 : index
    %129 = vector.load %arg6[%c0_52, %c12] : memref<8x14xf32, #tpu.memory_space<vmem>>, vector<8x1xf32>
    %130 = vector.broadcast %129 : vector<8x1xf32> to vector<8x256xf32>
    %131 = vector.broadcast %127 : vector<1x256xf32> to vector<8x256xf32>
    %132 = arith.mulf %130, %131 : vector<8x256xf32>
    %133 = arith.addf %123, %132 : vector<8x256xf32>
    %c0_53 = arith.constant 0 : index
    %c13 = arith.constant 13 : index
    %134 = vector.load %arg6[%c0_53, %c13] : memref<8x14xf32, #tpu.memory_space<vmem>>, vector<8x1xf32>
    %135 = vector.broadcast %134 : vector<8x1xf32> to vector<8x256xf32>
    %136 = vector.broadcast %128 : vector<1x256xf32> to vector<8x256xf32>
    %137 = arith.mulf %135, %136 : vector<8x256xf32>
    %138 = arith.addf %133, %137 : vector<8x256xf32>
    %cst_54 = arith.constant 0.000000e+00 : f32
    %139 = vector.broadcast %cst_54 : f32 to vector<8x256xf32>
    %c48_i32 = arith.constant 48 : i32
    %140 = tpu.dynamic_rotate %138 by %c48_i32 dim 1 : vector<8x256xf32>, i32 -> vector<8x256xf32>
    %c0_55 = arith.constant 0 : index
    %c0_56 = arith.constant 0 : index
    %c0_57 = arith.constant 0 : index
    %141 = vector.load %arg8[%c0_55, %c0_56, %c0_57] : memref<7x8x256xf32, #tpu.memory_space<vmem>>, vector<1x8x256xf32>
    %142 = vector.shape_cast %141 : vector<1x8x256xf32> to vector<8x256xf32>
    %143 = arith.mulf %140, %142 : vector<8x256xf32>
    %144 = arith.addf %139, %143 : vector<8x256xf32>
    %c32_i32 = arith.constant 32 : i32
    %145 = tpu.dynamic_rotate %138 by %c32_i32 dim 1 : vector<8x256xf32>, i32 -> vector<8x256xf32>
    %c1_58 = arith.constant 1 : index
    %c0_59 = arith.constant 0 : index
    %c0_60 = arith.constant 0 : index
    %146 = vector.load %arg8[%c1_58, %c0_59, %c0_60] : memref<7x8x256xf32, #tpu.memory_space<vmem>>, vector<1x8x256xf32>
    %147 = vector.shape_cast %146 : vector<1x8x256xf32> to vector<8x256xf32>
    %148 = arith.mulf %145, %147 : vector<8x256xf32>
    %149 = arith.addf %144, %148 : vector<8x256xf32>
    %c16_i32 = arith.constant 16 : i32
    %150 = tpu.dynamic_rotate %138 by %c16_i32 dim 1 : vector<8x256xf32>, i32 -> vector<8x256xf32>
    %c2_61 = arith.constant 2 : index
    %c0_62 = arith.constant 0 : index
    %c0_63 = arith.constant 0 : index
    %151 = vector.load %arg8[%c2_61, %c0_62, %c0_63] : memref<7x8x256xf32, #tpu.memory_space<vmem>>, vector<1x8x256xf32>
    %152 = vector.shape_cast %151 : vector<1x8x256xf32> to vector<8x256xf32>
    %153 = arith.mulf %150, %152 : vector<8x256xf32>
    %154 = arith.addf %149, %153 : vector<8x256xf32>
    %c3_64 = arith.constant 3 : index
    %c0_65 = arith.constant 0 : index
    %c0_66 = arith.constant 0 : index
    %155 = vector.load %arg8[%c3_64, %c0_65, %c0_66] : memref<7x8x256xf32, #tpu.memory_space<vmem>>, vector<1x8x256xf32>
    %156 = vector.shape_cast %155 : vector<1x8x256xf32> to vector<8x256xf32>
    %157 = arith.mulf %138, %156 : vector<8x256xf32>
    %158 = arith.addf %154, %157 : vector<8x256xf32>
    %c240_i32 = arith.constant 240 : i32
    %159 = tpu.dynamic_rotate %138 by %c240_i32 dim 1 : vector<8x256xf32>, i32 -> vector<8x256xf32>
    %c4_67 = arith.constant 4 : index
    %c0_68 = arith.constant 0 : index
    %c0_69 = arith.constant 0 : index
    %160 = vector.load %arg8[%c4_67, %c0_68, %c0_69] : memref<7x8x256xf32, #tpu.memory_space<vmem>>, vector<1x8x256xf32>
    %161 = vector.shape_cast %160 : vector<1x8x256xf32> to vector<8x256xf32>
    %162 = arith.mulf %159, %161 : vector<8x256xf32>
    %163 = arith.addf %158, %162 : vector<8x256xf32>
    %c224_i32 = arith.constant 224 : i32
    %164 = tpu.dynamic_rotate %138 by %c224_i32 dim 1 : vector<8x256xf32>, i32 -> vector<8x256xf32>
    %c5_70 = arith.constant 5 : index
    %c0_71 = arith.constant 0 : index
    %c0_72 = arith.constant 0 : index
    %165 = vector.load %arg8[%c5_70, %c0_71, %c0_72] : memref<7x8x256xf32, #tpu.memory_space<vmem>>, vector<1x8x256xf32>
    %166 = vector.shape_cast %165 : vector<1x8x256xf32> to vector<8x256xf32>
    %167 = arith.mulf %164, %166 : vector<8x256xf32>
    %168 = arith.addf %163, %167 : vector<8x256xf32>
    %c208_i32 = arith.constant 208 : i32
    %169 = tpu.dynamic_rotate %138 by %c208_i32 dim 1 : vector<8x256xf32>, i32 -> vector<8x256xf32>
    %c6_73 = arith.constant 6 : index
    %c0_74 = arith.constant 0 : index
    %c0_75 = arith.constant 0 : index
    %170 = vector.load %arg8[%c6_73, %c0_74, %c0_75] : memref<7x8x256xf32, #tpu.memory_space<vmem>>, vector<1x8x256xf32>
    %171 = vector.shape_cast %170 : vector<1x8x256xf32> to vector<8x256xf32>
    %172 = arith.mulf %169, %171 : vector<8x256xf32>
    %173 = arith.addf %168, %172 : vector<8x256xf32>
    %cst_76 = arith.constant dense<0.000000e+00> : vector<256xf32>
    %174 = vector.multi_reduction <add>, %173, %cst_76 [0] : vector<8x256xf32> to vector<256xf32>
    %175 = vector.shape_cast %174 : vector<256xf32> to vector<1x256xf32>
    %c0_77 = arith.constant 0 : index
    %176 = memref.load %arg9[%c0_77] : memref<2xf32, #tpu.memory_space<smem>>
    %177 = vector.broadcast %176 : f32 to vector<1x256xf32>
    %178 = arith.mulf %175, %177 : vector<1x256xf32>
    %c1_78 = arith.constant 1 : index
    %179 = memref.load %arg9[%c1_78] : memref<2xf32, #tpu.memory_space<smem>>
    %180 = vector.broadcast %179 : f32 to vector<1x256xf32>
    %181 = arith.addf %178, %180 : vector<1x256xf32>
    %182 = arith.negf %181 : vector<1x256xf32>
    %183 = math.exp %182 : vector<1x256xf32>
    %cst_79 = arith.constant 1.000000e+00 : f32
    %184 = vector.broadcast %cst_79 : f32 to vector<1x256xf32>
    %185 = arith.addf %184, %183 : vector<1x256xf32>
    %186 = arith.divf %184, %185 : vector<1x256xf32>
    %187 = vector.broadcast %186 : vector<1x256xf32> to vector<64x256xf32>
    %188 = arith.mulf %28, %187 : vector<64x256xf32>
    %c0_80 = arith.constant 0 : index
    %c0_81 = arith.constant 0 : index
    %c0_82 = arith.constant 0 : index
    %189 = vector.load %arg10[%c0_80, %c0_81, %c0_82] : memref<1x64x256xf32, #tpu.memory_space<vmem>>, vector<1x64x256xf32>
    %190 = vector.shape_cast %189 : vector<1x64x256xf32> to vector<64x256xf32>
    %191 = vector.shape_cast %188 : vector<64x256xf32> to vector<1x64x256xf32>
    tpu.vector_store %arg10[%c0_80, %c0_81, %c0_82], %191 {strides = array<i32>} : memref<1x64x256xf32, #tpu.memory_space<vmem>>, vector<1x64x256xf32>,
    return
  }
  func.func @transform_0(%arg0: i32) -> (i32, i32, i32) {
    %c0_i32 = arith.constant 0 : i32
    %c0_i32_0 = arith.constant 0 : i32
    %c0_i32_1 = arith.constant 0 : i32
    return %arg0, %c0_i32, %c0_i32_0 : i32, i32, i32
  }
  func.func @transform_1(%arg0: i32) -> (i32, i32) {
    %c0_i32 = arith.constant 0 : i32
    %c0_i32_0 = arith.constant 0 : i32
    %c0_i32_1 = arith.constant 0 : i32
    return %c0_i32, %c0_i32_0 : i32, i32
  }
  func.func @transform_2(%arg0: i32) -> (i32, i32) {
    %c0_i32 = arith.constant 0 : i32
    %c0_i32_0 = arith.constant 0 : i32
    %c0_i32_1 = arith.constant 0 : i32
    return %c0_i32, %c0_i32_0 : i32, i32
  }
  func.func @transform_3(%arg0: i32) -> (i32, i32) {
    %c0_i32 = arith.constant 0 : i32
    %c0_i32_0 = arith.constant 0 : i32
    %c0_i32_1 = arith.constant 0 : i32
    return %c0_i32, %c0_i32_0 : i32, i32
  }
  func.func @transform_4(%arg0: i32) -> (i32, i32) {
    %c0_i32 = arith.constant 0 : i32
    %c0_i32_0 = arith.constant 0 : i32
    %c0_i32_1 = arith.constant 0 : i32
    return %c0_i32, %c0_i32_0 : i32, i32
  }
  func.func @transform_5(%arg0: i32) -> (i32, i32) {
    %c0_i32 = arith.constant 0 : i32
    %c0_i32_0 = arith.constant 0 : i32
    %c0_i32_1 = arith.constant 0 : i32
    return %c0_i32, %c0_i32_0 : i32, i32
  }
  func.func @transform_6(%arg0: i32) -> (i32, i32) {
    %c0_i32 = arith.constant 0 : i32
    %c0_i32_0 = arith.constant 0 : i32
    %c0_i32_1 = arith.constant 0 : i32
    return %c0_i32, %c0_i32_0 : i32, i32
  }
  func.func @transform_7(%arg0: i32) -> (i32, i32, i32) {
    %c0_i32 = arith.constant 0 : i32
    %c0_i32_0 = arith.constant 0 : i32
    %c0_i32_1 = arith.constant 0 : i32
    %c0_i32_2 = arith.constant 0 : i32
    return %c0_i32, %c0_i32_0, %c0_i32_1 : i32, i32, i32
  }
  func.func @transform_8(%arg0: i32) -> i32 {
    %c0_i32 = arith.constant 0 : i32
    %c0_i32_0 = arith.constant 0 : i32
    return %c0_i32 : i32
  }
  func.func @transform_9(%arg0: i32) -> (i32, i32, i32) {
    %c0_i32 = arith.constant 0 : i32
    %c0_i32_0 = arith.constant 0 : i32
    %c0_i32_1 = arith.constant 0 : i32
    return %arg0, %c0_i32, %c0_i32_0 : i32, i32, i32
  }
}

</mosaic_0001>

<bundles_post_ra>
// kernel: se_plus_forward.1
= control target key start
LH: loop header
LB: loop body
LE: loop exit
PB: predicated region body
PF: predicated region fallthrough
CT: control target
= control target key end

     0   :  { %14 = vsyncpa [#allocation3], 0  ;;  %s1547_s30 = smov 0   ;;  %s2135_s0 = inlined_call_operand.vmem [shape: f32[2,64,256], index: 0, kind: input, shape index: {}]   ;;  %s2136_s1 = inlined_call_operand.vmem [shape: f32[64,4], index: 1, kind: input, shape index: {}]   ;;  %s2137_s2 = inlined_call_operand.vmem [shape: f32[1,4], index: 2, kind: input, shape index: {}]   ;;  %s2138_s3 = inlined_call_operand.vmem [shape: f32[64,4], index: 3, kind: input, shape index: {}]   ;;  %s2139_s4 = inlined_call_operand.vmem [shape: f32[64,1], index: 4, kind: input, shape index: {}]   ;;  %s2140_s5 = inlined_call_operand.vmem [shape: f32[8,14], index: 5, kind: input, shape index: {}]   ;;  %s2141_s6 = inlined_call_operand.vmem [shape: f32[7,256], index: 6, kind: input, shape index: {}]   ;;  %s2142_s7 = inlined_call_operand.vmem [shape: f32[7,8,256], index: 7, kind: input, shape index: {}]   ;;  %s2143_s8 = inlined_call_operand.vmem [shape: f32[2], index: 8, kind: input, shape index: {}]   ;;  %s2144_s9 = inlined_call_operand.vmem [shape: f32[2,64,256], index: 9, kind: output, shape index: {}]  }
   0x1 LB: > { %s1299_s10 = sadd.s32 4294967295, %s1468_s30   ;;  %p1301_p0 = scmp.ge.s32.totalorder %s1468_s30, 1  ;;  %s1468_s30 = sphi %s1547_s30, %s20_s30  }
   0x2   : > { %p245_p1 = scmp.lt.s32.totalorder %s1468_s30, 3  ;;  %s279_s13 = sshll.u32 %s2143_s8, 4  ;;  %s280_s13 = int_to_ptr.vmem [resolvable:$true] %s279_s13 }
   0x3   : > { %p1351_p3 = scmp.eq.s32.totalorder %s1299_s10, 0  ;;  %s1443_s15 = scalar_lea.vmem %s280_s13, 16 }
   0x4   : > { %p1558_p2 = pnand %p1301_p0, %p245_p1  ;;  %p1444_p6 = scmp.ne.s32.totalorder %s280_s13, %s1443_s15 }
   0x5   : > { %p1451_p10 = scmp.lt.s32.totalorder %s280_s13, %s280_s13  ;;  %p1452_p11 = scmp.lt.s32.totalorder %s1443_s15, %s1443_s15 }
   0x6   : > { %p1347_p4 = pneg %p1558_p2 }
   0x7   : > { %p1453_p12 = por %p1452_p11, %p1451_p10 }
   0x8   : > { %p1348_p5 = pnand %p1351_p3, %p1347_p4 }
   0xa   : > { %p1445_p7 = pneg %p1348_p5 }
   0xc   : > { %p1446_p8 = pnand %p1445_p7, %p1444_p6 }
   0xe   : > { %p1447_p9 = pneg %p1446_p8 }
  0x10   : > { %p1454_p13 = pnand %p1453_p12, %p1447_p9 }
  0x12   : > { %1457 = shalt.err (!%p1454_p13)
}
  0x13   : > { %s1470_s16 = smov [#allocation2]   ;;  %300 = sbr.rel (%p1558_p2) target bundleno = 965 (0x3c5), region = 56 }
  0x14   : > { %1350 = dma.vmem_to_smem (!%p1348_p5), %s280_s13, 16, %s1470_s16, [#allocation3]  }
  0x1a   : > { %1463 = dma.done.wait (%p1351_p3), [#allocation3], 16  }
  0x1b   : > { %1465 = vsyncadd (%p1351_p3), [#allocation3], 4294967280 }
  0x1c   : > { %306 = sfence }
  0x1d   : > { %p337_p0 = scmp.lt.s32.totalorder %s1299_s10, 1  ;;  %v395_v27 = vld [vmem:[%s2136_s1] sm:$0xff]  ;;  %v397_v29 = vld [vmem:[%s2136_s1 + $0x10] sm:$0xff]  ;;  %v396_v30 = vld [vmem:[%s2136_s1 + $0x8] sm:$0xff]  ;;  %vm411_vm0 = vcmask 31744   ;;  %s1482_s19 = smov 127  }
  0x1e   : > { %v398_v34 = vld [vmem:[%s2136_s1 + $0x18] sm:$0xff]  ;;  %v399_v40 = vld [vmem:[%s2136_s1 + $0x20] sm:$0xff]  ;;  %v400_v45 = vld [vmem:[%s2136_s1 + $0x28] sm:$0xff]  ;;  %s1484_s21 = smov 2   ;;  %s1486_s22 = smov 1  }
  0x1f   : > { %s2156_s10 = smov (!%p337_p0, %s1299_s10), 1  ;;  %v401_v54 = vld [vmem:[%s2136_s1 + $0x30] sm:$0xff]  ;;  %v402_v58 = vld [vmem:[%s2136_s1 + $0x38] sm:$0xff]  ;;  %s1489_s23 = smov 126  }
  0x20   : > { %s1341_s17 = sshll.u32 %s2156_s10, 7  ;;  %s1490_s24 = smov 125  }
  0x21   : > { %s341_s20 = scalar_lea.vmem %s2135_s0, %s1341_s17  ;;  %s1495_s25 = smov 96  }
  0x22   : > { %v1577_v0 = vld [vmem:[%s341_s20] sm:$0xff]  ;;  %v1579_v1 = vld [vmem:[%s341_s20 + $0x8] sm:$0xff]  ;;  %v1587_v5 = vld [vmem:[%s341_s20 + $0x10] sm:$0xff]  ;;  %s1496_s26 = smov 80  }
  0x23   : > { %v1581_v2 = vld [vmem:[%s341_s20 + $0x20] sm:$0xff]  ;;  %v363_v3 = vadd.f32 %v1579_v1, %v1577_v0  ;;  %v1585_v4 = vld [vmem:[%s341_s20 + $0x28] sm:$0xff]  ;;  %v1589_v6 = vld [vmem:[%s341_s20 + $0x18] sm:$0xff] }
  0x24   : > { %v369_v7 = vadd.f32 %v1585_v4, %v1581_v2  ;;  %v1593_v8 = vld [vmem:[%s341_s20 + $0x30] sm:$0xff]  ;;  %v1595_v9 = vld [vmem:[%s341_s20 + $0x38] sm:$0xff]  ;;  %v366_v10 = vadd.f32 %v1589_v6, %v1587_v5  ;;  %v1601_v12 = vld [vmem:[%s341_s20 + $0x40] sm:$0xff] }
  0x25   : > { %364 = vadd.xlane.f32.xlu0 %v363_v3  ;;  %v372_v11 = vadd.f32 %v1595_v9, %v1593_v8  ;;  %v1603_v13 = vld [vmem:[%s341_s20 + $0x48] sm:$0xff]  ;;  %v1605_v14 = vld [vmem:[%s341_s20 + $0x50] sm:$0xff]  ;;  %v1607_v15 = vld [vmem:[%s341_s20 + $0x58] sm:$0xff] }
  0x26   : > { %370 = vadd.xlane.f32.xlu1 %v369_v7  ;;  %v375_v16 = vadd.f32 %v1603_v13, %v1601_v12  ;;  %v378_v17 = vadd.f32 %v1607_v15, %v1605_v14  ;;  %v1613_v18 = vld [vmem:[%s341_s20 + $0x60] sm:$0xff]  ;;  %v1615_v19 = vld [vmem:[%s341_s20 + $0x68] sm:$0xff]  ;;  %v1617_v20 = vld [vmem:[%s341_s20 + $0x70] sm:$0xff] }
  0x27   : > { %v1619_v21 = vld [vmem:[%s341_s20 + $0x78] sm:$0xff]  ;;  %v381_v22 = vadd.f32 %v1615_v19, %v1613_v18  ;;  %s1483_s20 = smov 3  }
  0x28   : > { %v384_v23 = vadd.f32 %v1619_v21, %v1617_v20 }
  0x29   : > { %367 = vadd.xlane.f32.xlu0 %v366_v10 }
  0x2a   : > { %373 = vadd.xlane.f32.xlu1 %v372_v11 }
  0x2d   : > { %376 = vadd.xlane.f32.xlu0 %v375_v16 }
  0x2e   : > { %379 = vadd.xlane.f32.xlu1 %v378_v17 }
  0x31   : > { %382 = vadd.xlane.f32.xlu0 %v381_v22 }
  0x32   : > { %385 = vadd.xlane.f32.xlu1 %v384_v23 }
  0xb2   : > { %v365_v24 = vpop.xlane.xlu0 %364 }
  0xb3   : > { %v387_v25 = vmul.f32 0.00390625, %v365_v24  ;;  %v371_v26 = vpop.xlane.xlu1 %370 }
  0xb4   : > { %v389_v28 = vmul.f32 0.00390625, %v371_v26 }
  0xb5   : > { %v403_v32 = vmul.f32 %v395_v27, %v387_v25  ;;  %v444_v25 = vlaneseq }
  0xb6   : > { %v368_v31 = vpop.xlane.xlu0 %367  ;;  %v405_v37 = vmul.f32 %v397_v29, %v389_v28 }
  0xb7   : > { %v388_v33 = vmul.f32 0.00390625, %v368_v31  ;;  %v374_v35 = vpop.xlane.xlu1 %373  ;;  %v412_v42 = vsel %vm411_vm0, %v403_v32, 0.0  ;;  %v1658_v28 = vshrl.u32 %v444_v25, 7 }
  0xb8   : > { %v390_v36 = vmul.f32 0.00390625, %v374_v35  ;;  %v415_v49 = vsel %vm411_vm0, %v405_v37, 0.0  ;;  %v437_v35 = vld [vmem:[%s2138_s3 + $0x8] sm:$0xff] }
  0xb9   : > { %v404_v38 = vmul.f32 %v396_v30, %v388_v33  ;;  %v433_v30 = vld [vmem:[%s2137_s2] sm:$0x1]  ;;  %v1664_v32 = vsub.s32 0, %v1658_v28 }
  0xba   : > { %v406_v39 = vmul.f32 %v398_v34, %v390_v36  ;;  %v377_v41 = vpop.xlane.xlu0 %376  ;;  %v436_v36 = vld [vmem:[%s2138_s3] sm:$0xff] }
  0xbb   : > { %v413_v43 = vsel %vm411_vm0, %v404_v38, 0.0  ;;  %v391_v44 = vmul.f32 0.00390625, %v377_v41  ;;  %v380_v46 = vpop.xlane.xlu1 %379  ;;  %v439_v38 = vld [vmem:[%s2138_s3 + $0x18] sm:$0xff] }
  0xbc   : > { %v414_v47 = vadd.f32 %v413_v43, %v412_v42  ;;  %v392_v48 = vmul.f32 0.00390625, %v380_v46  ;;  %v417_v50 = vsel %vm411_vm0, %v406_v39, 0.0  ;;  %v438_v39 = vld [vmem:[%s2138_s3 + $0x10] sm:$0xff]  ;;  %v441_v46 = vld [vmem:[%s2138_s3 + $0x28] sm:$0xff] }
  0xbd   : > { %v407_v51 = vmul.f32 %v399_v40, %v391_v44 }
  0xbe   : > { %v416_v52 = vadd.f32 %v415_v49, %v414_v47  ;;  %v408_v53 = vmul.f32 %v400_v45, %v392_v48  ;;  %v383_v55 = vpop.xlane.xlu0 %382  ;;  %v440_v47 = vld [vmem:[%s2138_s3 + $0x20] sm:$0xff] }
  0xbf   : > { %v419_v56 = vsel %vm411_vm0, %v407_v51, 0.0  ;;  %v393_v57 = vmul.f32 0.00390625, %v383_v55  ;;  %v386_v59 = vpop.xlane.xlu1 %385 }
  0xc0   : > { %v418_v60 = vadd.f32 %v417_v50, %v416_v52  ;;  %v394_v61 = vmul.f32 0.00390625, %v386_v59  ;;  %v421_v62 = vsel %vm411_vm0, %v408_v53, 0.0  ;;  %v443_v52 = vld [vmem:[%s2138_s3 + $0x38] sm:$0xff]  ;;  %v442_v53 = vld [vmem:[%s2138_s3 + $0x30] sm:$0xff] }
  0xc1   : > { %v409_v63 = vmul.f32 %v401_v54, %v393_v57 }
  0xc2   : > { %v420_v3 = vadd.f32 %v419_v56, %v418_v60  ;;  %v410_v7 = vmul.f32 %v402_v58, %v394_v61  ;;  %v1471_v60 = vmov 0   ;;  %v481_v61 = vld [vmem:[%s2139_s4 + $0x8] sm:$0xff] }
  0xc3   : > { %v423_v10 = vsel %vm411_vm0, %v409_v63, 0.0  ;;  %1389 = vset.pattern.permute.xlu1 %v1471_v60  ;;  %1388 = vset.pattern.permute.xlu0 %v1471_v60 }
  0xc4   : > { %v422_v11 = vadd.f32 %v421_v62, %v420_v3  ;;  %v425_v16 = vsel %vm411_vm0, %v410_v7, 0.0  ;;  %v480_v62 = vld [vmem:[%s2139_s4] sm:$0xff] }
  0xc6   : > { %v424_v17 = vadd.f32 %v423_v10, %v422_v11  ;;  %v483_v11 = vld [vmem:[%s2139_s4 + $0x18] sm:$0xff] }
  0xc8   : > { %v426_v22 = vadd.f32 %v425_v16, %v424_v17  ;;  %v482_v16 = vld [vmem:[%s2139_s4 + $0x10] sm:$0xff] }
  0xca   : > { %v427_v23 = vrot.slane %v426_v22, 4 }
  0xcc   : > { %v428_v24 = vadd.f32 %v427_v23, %v426_v22 }
  0xce   : > { %v429_v26 = vrot.slane %v428_v24, 2 }
  0xd0   : > { %v430_v27 = vadd.f32 %v429_v26, %v428_v24 }
  0xd2   : > { %v431_v29 = vrot.slane %v430_v27, 1 }
  0xd4   : > { %v432_v31 = vadd.f32 %v431_v29, %v430_v27  ;;  %v485_v29 = vld [vmem:[%s2139_s4 + $0x28] sm:$0xff] }
  0xd6   : > { %v434_v33 = vadd.f32 %v433_v30, %v432_v31  ;;  %v484_v30 = vld [vmem:[%s2139_s4 + $0x20] sm:$0xff] }
  0xd8   : > { %v435_v34 = vmax.f32 %v434_v33, 0.0 }
  0xda   : > { %v447_v37 = vrot.slane %v435_v34, %v1664_v32 }
  0xdc   : > { %v449_v40 = vmul.f32 %v447_v37, %v437_v35  ;;  %v448_v41 = vmul.f32 %v447_v37, %v436_v36  ;;  %v451_v44 = vmul.f32 %v447_v37, %v439_v38  ;;  %v450_v45 = vmul.f32 %v447_v37, %v438_v39  ;;  %v486_v39 = vld [vmem:[%s2139_s4 + $0x30] sm:$0xff] }
  0xdd   : > { %v453_v50 = vmul.f32 %v447_v37, %v441_v46  ;;  %v452_v51 = vmul.f32 %v447_v37, %v440_v47  ;;  %v455_v56 = vmul.f32 %v447_v37, %v443_v52  ;;  %v454_v57 = vmul.f32 %v447_v37, %v442_v53 }
  0xde   : > { %v459_v42 = vsel %vm411_vm0, %v449_v40, 0.0  ;;  %v456_v43 = vsel %vm411_vm0, %v448_v41, 0.0  ;;  %v465_v48 = vsel %vm411_vm0, %v451_v44, 0.0  ;;  %v462_v49 = vsel %vm411_vm0, %v450_v45, 0.0  ;;  %v487_v44 = vld [vmem:[%s2139_s4 + $0x38] sm:$0xff] }
  0xdf   : > { %460 = vadd.xlane.f32.xlu1 %v459_v42  ;;  %457 = vadd.xlane.f32.xlu0 %v456_v43  ;;  %v471_v54 = vsel %vm411_vm0, %v453_v50, 0.0  ;;  %v468_v55 = vsel %vm411_vm0, %v452_v51, 0.0  ;;  %v477_v58 = vsel %vm411_vm0, %v455_v56, 0.0  ;;  %v474_v59 = vsel %vm411_vm0, %v454_v57, 0.0 }
  0xe3   : > { %466 = vadd.xlane.f32.xlu1 %v465_v48  ;;  %463 = vadd.xlane.f32.xlu0 %v462_v49 }
  0xe7   : > { %472 = vadd.xlane.f32.xlu1 %v471_v54  ;;  %469 = vadd.xlane.f32.xlu0 %v468_v55 }
  0xeb   : > { %478 = vadd.xlane.f32.xlu1 %v477_v58  ;;  %475 = vadd.xlane.f32.xlu0 %v474_v59 }
 0x16c   : > { %v461_v63 = vpop.xlane.xlu1 %460  ;;  %v458_v3 = vpop.xlane.xlu0 %457 }
 0x16d   : > { %v489_v7 = vadd.f32 %v481_v61, %v461_v63  ;;  %v488_v10 = vadd.f32 %v480_v62, %v458_v3  ;;  %v1726_v63 = vld [vmem:[%s2140_s5] sm:$0xff] }
 0x16f   : > { %v1311_v17 = vmul.f32 -1.442695, %v489_v7  ;;  %v1310_v22 = vmul.f32 -1.442695, %v488_v10  ;;  %v1472_v7 = vmov 1  }
 0x170   : > { %v467_v23 = vpop.xlane.xlu1 %466  ;;  %v464_v24 = vpop.xlane.xlu0 %463 }
 0x171   : > { %1403 = vpow2.f32 %v1311_v17  ;;  %v491_v26 = vadd.f32 %v483_v11, %v467_v23  ;;  %v490_v27 = vadd.f32 %v482_v16, %v464_v24  ;;  %v1474_v24 = vmov 3  }
 0x172   : > { %1405 = vpow2.f32 %v1310_v22  ;;  %v1473_v22 = vmov 2  }
 0x173   : > { %v1313_v31 = vmul.f32 -1.442695, %v491_v26  ;;  %v1312_v33 = vmul.f32 -1.442695, %v490_v27 }
 0x174   : > { %v473_v34 = vpop.xlane.xlu1 %472  ;;  %v470_v35 = vpop.xlane.xlu0 %469 }
 0x175   : > { %1407 = vpow2.f32 %v1313_v31  ;;  %v493_v36 = vadd.f32 %v485_v29, %v473_v34  ;;  %v492_v37 = vadd.f32 %v484_v30, %v470_v35  ;;  %v1475_v29 = vmov 4  }
 0x176   : > { %1409 = vpow2.f32 %v1312_v33  ;;  %v1476_v31 = vmov 5   ;;  %v1477_v33 = vmov 6   ;;  %v1478_v34 = vmov 7  }
 0x177   : > { %v1314_v38 = vmul.f32 -1.442695, %v492_v37  ;;  %v1315_v41 = vmul.f32 -1.442695, %v493_v36  ;;  %v1479_v35 = vmov 9   ;;  %v1480_v36 = vmov 8  }
 0x178   : > { %v476_v40 = vpop.xlane.xlu0 %475  ;;  %v479_v45 = vpop.xlane.xlu1 %478  ;;  %v1481_v37 = vmov 10  }
 0x179   : > { %1411 = vpow2.f32 %v1314_v38  ;;  %v494_v42 = vadd.f32 %v486_v39, %v476_v40  ;;  %v495_v49 = vadd.f32 %v487_v44, %v479_v45 }
 0x17a   : > { %1413 = vpow2.f32 %v1315_v41 }
 0x17b   : > { %v1404_v43 = vpop.eup %1403  ;;  %v1316_v50 = vmul.f32 -1.442695, %v494_v42  ;;  %v1317_v54 = vmul.f32 -1.442695, %v495_v49 }
 0x17c   : > { %v1406_v46 = vpop.eup %1405  ;;  %v521_v47 = vadd.f32 1.0, %v1404_v43 }
 0x17d   : > { %v520_v48 = vadd.f32 1.0, %v1406_v46 }
 0x17e   : > { %1415 = vrcp.f32 %v521_v47 }
 0x17f   : > { %v1408_v51 = vpop.eup %1407  ;;  %1417 = vrcp.f32 %v520_v48 }
 0x180   : > { %v1410_v52 = vpop.eup %1409  ;;  %1419 = vpow2.f32 %v1316_v50  ;;  %v523_v55 = vadd.f32 1.0, %v1408_v51 }
 0x181   : > { %v522_v53 = vadd.f32 1.0, %v1410_v52 }
 0x183   : > { %1421 = vrcp.f32 %v522_v53  ;;  %v1412_v56 = vpop.eup %1411 }
 0x184   : > { %1423 = vpow2.f32 %v1317_v54  ;;  %v1414_v57 = vpop.eup %1413  ;;  %v524_v58 = vadd.f32 1.0, %v1412_v56 }
 0x185   : > { %1425 = vrcp.f32 %v523_v55  ;;  %v525_v61 = vadd.f32 1.0, %v1414_v57 }
 0x186   : > { %1427 = vrcp.f32 %v524_v58 }
 0x187   : > { %1429 = vrcp.f32 %v525_v61 }
 0x188   : > { %v1416_v59 = vpop.eup %1415 }
 0x189   : > { %v1418_v60 = vpop.eup %1417  ;;  %551 = vperm.xlu1 %1389, %v1416_v59  }
 0x18a   : > { %546 = vperm.xlu0 %1388, %v1418_v60   ;;  %v1420_v62 = vpop.eup %1419 }
 0x18b   : > { %v526_v10 = vadd.f32 1.0, %v1420_v62 }
 0x18d   : > { %v1422_v3 = vpop.eup %1421  ;;  %1431 = vrcp.f32 %v526_v10 }
 0x18e   : > { %556 = vperm.xlu1 %1389, %v1422_v3   ;;  %1390 = vset.pattern.permute.xlu0 %v1472_v7  ;;  %v1424_v11 = vpop.eup %1423 }
 0x18f   : > { %704 = vperm.xlu0 %1390, %v1726_v63   ;;  %v1426_v16 = vpop.eup %1425  ;;  %v527_v17 = vadd.f32 1.0, %v1424_v11 }
 0x190   : > { %v1428_v23 = vpop.eup %1427 }
 0x191   : > { %1433 = vrcp.f32 %v527_v17  ;;  %v1430_v26 = vpop.eup %1429 }
 0x192   : > { %561 = vperm.xlu1 %1389, %v1426_v16  }
 0x193   : > { %1391 = vset.pattern.permute.xlu0 %v1473_v22 }
 0x194   : > { %750 = vperm.xlu0 %1391, %v1726_v63  }
 0x196   : > { %566 = vperm.xlu1 %1389, %v1428_v23  }
 0x197   : > { %v1432_v27 = vpop.eup %1431 }
 0x198   : > { %1392 = vset.pattern.permute.xlu0 %v1474_v24 }
 0x199   : > { %766 = vperm.xlu0 %1392, %v1726_v63  }
 0x19a   : > { %571 = vperm.xlu1 %1389, %v1430_v26  }
 0x19b   : > { %v1434_v30 = vpop.eup %1433 }
 0x19d   : > { %1393 = vset.pattern.permute.xlu0 %v1475_v29 }
 0x19e   : > { %576 = vperm.xlu1 %1389, %v1432_v27   ;;  %812 = vperm.xlu0 %1393, %v1726_v63  }
 0x1a2   : > { %581 = vperm.xlu1 %1389, %v1434_v30   ;;  %1394 = vset.pattern.permute.xlu0 %v1476_v31 }
 0x1a3   : > { %828 = vperm.xlu0 %1394, %v1726_v63  }
 0x1a6   : > { %688 = vperm.xlu1 %1389, %v1726_v63  }
 0x1a7   : > { %1395 = vset.pattern.permute.xlu0 %v1477_v33 }
 0x1a8   : > { %861 = vperm.xlu0 %1395, %v1726_v63  }
 0x1aa   : > { %1396 = vset.pattern.permute.xlu1 %v1478_v34 }
 0x1ab   : > { %877 = vperm.xlu1 %1396, %v1726_v63  }
 0x1ac   : > { %1398 = vset.pattern.permute.xlu0 %v1479_v35 }
 0x1ad   : > { %939 = vperm.xlu0 %1398, %v1726_v63  }
 0x1af   : > { %1397 = vset.pattern.permute.xlu1 %v1480_v36 }
 0x1b0   : > { %923 = vperm.xlu1 %1397, %v1726_v63  }
 0x1b1   : > { %1399 = vset.pattern.permute.xlu0 %v1481_v37 }
 0x208   : > { %v552_v38 = vpop.permute.xlu1 %551 }
 0x209   : > { %v547_v40 = vpop.permute.xlu0 %546  ;;  %v1739_v42 = vmul.f32 %v552_v38, %v1587_v5 }
 0x20a   : > { %v1742_v43 = vmul.f32 %v547_v40, %v1577_v0 }
 0x20c   : > { %v626_v46 = vadd.f32 %v1739_v42, %v1742_v43 }
 0x20d   : > { %v557_v39 = vpop.permute.xlu1 %556 }
 0x20e   : > { %v1745_v45 = vmul.f32 %v557_v39, %v1581_v2  ;;  %v1757_v5 = vmul.f32 %v557_v39, %v1585_v4 }
 0x210   : > { %v627_v49 = vadd.f32 %v626_v46, %v1745_v45 }
 0x211   : > { %v562_v41 = vpop.permute.xlu1 %561 }
 0x212   : > { %v1750_v47 = vmul.f32 %v562_v41, %v1593_v8  ;;  %v1760_v0 = vmul.f32 %v562_v41, %v1595_v9  ;;  %v1767_v8 = vmul.f32 %v547_v40, %v1579_v1 }
 0x214   : > { %v628_v2 = vadd.f32 %v627_v49, %v1750_v47  ;;  %v613_v1 = vmax.f32 %v1767_v8, %v1757_v5 }
 0x215   : > { %v567_v44 = vpop.permute.xlu1 %566 }
 0x216   : > { %v1754_v50 = vmul.f32 %v567_v44, %v1601_v12  ;;  %v1770_v52 = vmul.f32 %v567_v44, %v1603_v13  ;;  %v1773_v12 = vmul.f32 %v552_v38, %v1589_v6  ;;  %v601_v13 = vmax.f32 %v1739_v42, %v1750_v47 }
 0x218   : > { %v629_v4 = vadd.f32 %v628_v2, %v1754_v50  ;;  %v614_v6 = vmax.f32 %v1773_v12, %v1760_v0  ;;  %v615_v56 = vmax.f32 %v613_v1, %v1770_v52  ;;  %v639_v40 = vadd.f32 %v1773_v12, %v1767_v8 }
 0x219   : > { %v572_v48 = vpop.permute.xlu1 %571  ;;  %v1487_v1 = vmov 12  }
 0x21a   : > { %v1764_v51 = vmul.f32 %v572_v48, %v1605_v14  ;;  %v1777_v9 = vmul.f32 %v572_v48, %v1607_v15  ;;  %v600_v14 = vmax.f32 %v1742_v43, %v1745_v45  ;;  %v640_v46 = vadd.f32 %v639_v40, %v1757_v5 }
 0x21c   : > { %v630_v55 = vadd.f32 %v629_v4, %v1764_v51  ;;  %v603_v57 = vmax.f32 %v601_v13, %v1764_v51  ;;  %v616_v59 = vmax.f32 %v614_v6, %v1777_v9  ;;  %v641_v48 = vadd.f32 %v640_v46, %v1760_v0 }
 0x21d   : > { %v577_v53 = vpop.permute.xlu1 %576  ;;  %v1485_v4 = vmov 11  }
 0x21e   : > { %v1780_v54 = vmul.f32 %v577_v53, %v1613_v18  ;;  %v1792_v15 = vmul.f32 %v577_v53, %v1615_v19  ;;  %v602_v18 = vmax.f32 %v600_v14, %v1754_v50  ;;  %v642_v49 = vadd.f32 %v641_v48, %v1770_v52 }
 0x220   : > { %2149 = vst [vmem:[#allocation5_spill] sm:$0xff] %v1792_v15  ;;  %v631_v60 = vadd.f32 %v630_v55, %v1780_v54  ;;  %v604_v19 = vmax.f32 %v602_v18, %v1780_v54  ;;  %v617_v3 = vmax.f32 %v615_v56, %v1792_v15  ;;  %v643_v2 = vadd.f32 %v642_v49, %v1777_v9  ;;  %v1318_v49 = vld [vmem:[%s2141_s6 + $0x1] ss:$8 sm:$0x3] }
 0x221   : > { %v582_v58 = vpop.permute.xlu1 %581  ;;  %v1488_v55 = vmov 13  }
 0x222   : > { %v1800_v61 = vmul.f32 %v582_v58, %v1617_v20  ;;  %v1803_v62 = vmul.f32 %v582_v58, %v1619_v21  ;;  %v644_v53 = vadd.f32 %v643_v2, %v1792_v15 }
 0x224   : > { %2150 = vst [vmem:[#allocation6_spill] sm:$0xff] %v1800_v61  ;;  %2151 = vst [vmem:[#allocation7_spill] sm:$0xff] %v1803_v62  ;;  %v605_v7 = vmax.f32 %v603_v57, %v1800_v61  ;;  %v618_v10 = vmax.f32 %v616_v59, %v1803_v62  ;;  %v632_v11 = vadd.f32 %v631_v60, %v1800_v61 }
 0x225   : > { %v645_v14 = vadd.f32 %v644_v53, %v1803_v62 }
 0x226   : > { %v606_v16 = vmax.f32 %v604_v19, %v605_v7  ;;  %v619_v17 = vmax.f32 %v617_v3, %v618_v10  ;;  %v633_v22 = vrot.slane %v632_v11, 4  ;;  %v705_v3 = vpop.permute.xlu0 %704 }
 0x227   : > { %v646_v13 = vrot.slane %v645_v14, 4 }
 0x228   : > { %v607_v23 = vrot.slane %v606_v16, 4  ;;  %v620_v24 = vrot.slane %v619_v17, 4  ;;  %v634_v20 = vadd.f32 %v633_v22, %v632_v11 }
 0x229   : > { %v647_v6 = vadd.f32 %v646_v13, %v645_v14  ;;  %v738_v13 = vrot.slane %v1318_v49, %v1664_v32 }
 0x22a   : > { %v608_v26 = vmax.f32 %v606_v16, %v607_v23  ;;  %v621_v27 = vmax.f32 %v619_v17, %v620_v24  ;;  %v635_v21 = vrot.slane %v634_v20, 2  ;;  %v1872_v10 = vpop.permute.xlu0 %750 }
 0x22b   : > { %v648_v18 = vrot.slane %v647_v6, 2 }
 0x22c   : > { %v609_v29 = vrot.slane %v608_v26, 2  ;;  %v622_v30 = vrot.slane %v621_v27, 2  ;;  %v636_v31 = vadd.f32 %v635_v21, %v634_v20 }
 0x22d   : > { %v649_v56 = vadd.f32 %v648_v18, %v647_v6 }
 0x22e   : > { %v610_v33 = vmax.f32 %v608_v26, %v609_v29  ;;  %v623_v34 = vmax.f32 %v621_v27, %v622_v30  ;;  %v637_v35 = vrot.slane %v636_v31, 1  ;;  %v1874_v17 = vpop.permute.xlu0 %766 }
 0x22f   : > { %v650_v57 = vrot.slane %v649_v56, 1 }
 0x230   : > { %v611_v36 = vrot.slane %v610_v33, 1  ;;  %v624_v38 = vrot.slane %v623_v34, 1  ;;  %v638_v39 = vadd.f32 %v637_v35, %v636_v31 }
 0x231   : > { %v651_v58 = vadd.f32 %v650_v57, %v649_v56 }
 0x232   : > { %v1810_v37 = vmax.f32 %v610_v33, %v611_v36  ;;  %v1818_v41 = vmax.f32 %v623_v34, %v624_v38  ;;  %v1820_v44 = vmul.f32 0.015625, %v638_v39  ;;  %v1876_v23 = vpop.permute.xlu0 %812  ;;  %v1891_v33 = vand.u32 127, %v444_v25  ;;  %v669_v36 = vld [vmem:[%s2141_s6] ss:$8 sm:$0x3] }
 0x233   : > { %v1848_v59 = vmul.f32 0.015625, %v651_v58  ;;  %v1901_v38 = vsub.s32 1, %v1658_v28  ;;  %v674_v40 = vrot.slane %v669_v36, %v1664_v32  ;;  %v1320_v58 = vld [vmem:[%s2141_s6 + $0x3] ss:$8 sm:$0x3] }
 0x234   : > { %892 = vrot.lane.b32.xlu0 %v1810_v37, %s1482_s19  ;;  %654 = vrot.lane.b32.xlu1 %v1810_v37, %s1483_s20  ;;  %vm660_vm1 = vcmp.lt.s32.totalorder %v1891_v33, 3  ;;  %vm723_vm2 = vcmp.lt.s32.totalorder %v1891_v33, 2  ;;  %vm785_vm3 = vcmp.lt.s32.totalorder %v1891_v33, 1  ;;  %vm896_vm4 = vcmp.lt.s32.totalorder %v1891_v33, 127 }
 0x235   : > { %v678_v25 = vrot.slane %v669_v36, %v1901_v38  ;;  %v742_v6 = vrot.slane %v1318_v49, %v1901_v38  ;;  %v853_v49 = vrot.slane %v1320_v58, %v1901_v38  ;;  %vm958_vm5 = vcmp.lt.s32.totalorder %v1891_v33, 126 }
 0x236   : > { %v1878_v26 = vpop.permute.xlu0 %828  ;;  %vm1020_vm6 = vcmp.lt.s32.totalorder %v1891_v33, 125  ;;  %vm1082_vm7 = vcmp.lt.s32.totalorder %v1891_v33, 48  ;;  %vm1095_vm8 = vcmp.lt.s32.totalorder %v1891_v33, 32  ;;  %vm1109_vm9 = vcmp.lt.s32.totalorder %v1891_v33, 16 }
 0x237   : > { %vm1130_vm10 = vcmp.lt.s32.totalorder %v1891_v33, 112  ;;  %vm1144_vm11 = vcmp.lt.s32.totalorder %v1891_v33, 96  ;;  %vm1158_vm12 = vcmp.lt.s32.totalorder %v1891_v33, 80 }
 0x238   : > { %663 = vrot.lane.b32.xlu0 %v1820_v44, %s1483_s20  ;;  %656 = vrot.lane.b32.xlu1 %v1818_v41, %s1483_s20 }
 0x23a   : > { %v1882_v21 = vpop.permute.xlu0 %861 }
 0x23c   : > { %719 = vrot.lane.b32.xlu1 %v1810_v37, %s1484_s21  ;;  %985 = vperm.xlu0 %1399, %v1726_v63  }
 0x23e   : > { %v1886_v30 = vpop.permute.xlu0 %939 }
 0x240   : > { %721 = vrot.lane.b32.xlu1 %v1818_v41, %s1484_s21  ;;  %1400 = vset.pattern.permute.xlu0 %v1485_v4 }
 0x241   : > { %1001 = vperm.xlu0 %1400, %v1726_v63  }
 0x244   : > { %781 = vrot.lane.b32.xlu1 %v1810_v37, %s1486_s22 }
 0x245   : > { %1401 = vset.pattern.permute.xlu0 %v1487_v1 }
 0x246   : > { %1047 = vperm.xlu0 %1401, %v1726_v63  }
 0x248   : > { %783 = vrot.lane.b32.xlu1 %v1818_v41, %s1486_s22 }
 0x24a   : > { %1402 = vset.pattern.permute.xlu0 %v1488_v55 }
 0x24b   : > { %1063 = vperm.xlu0 %1402, %v1726_v63   ;;  %v1866_v63 = vpop.permute.xlu1 %688 }
 0x24c   : > { %894 = vrot.lane.b32.xlu1 %v1818_v41, %s1482_s19 }
 0x24f   : > { %v1868_v60 = vpop.permute.xlu1 %877 }
 0x250   : > { %954 = vrot.lane.b32.xlu1 %v1810_v37, %s1489_s23 }
 0x253   : > { %v1870_v19 = vpop.permute.xlu1 %923 }
 0x254   : > { %956 = vrot.lane.b32.xlu1 %v1818_v41, %s1489_s23 }
 0x258   : > { %1016 = vrot.lane.b32.xlu1 %v1810_v37, %s1490_s24 }
 0x25c   : > { %1018 = vrot.lane.b32.xlu1 %v1818_v41, %s1490_s24 }
 0x260   : > { %665 = vrot.lane.b32.xlu1 %v1848_v59, %s1483_s20  ;;  %s1336_s20 = sld [smem:[#allocation2 + $0x1]] }
 0x264   : > { %726 = vrot.lane.b32.xlu1 %v1820_v44, %s1484_s21 }
 0x268   : > { %728 = vrot.lane.b32.xlu1 %v1848_v59, %s1484_s21  ;;  %s1491_s21 = smov 48  }
 0x26c   : > { %788 = vrot.lane.b32.xlu1 %v1820_v44, %s1486_s22 }
 0x270   : > { %790 = vrot.lane.b32.xlu1 %v1848_v59, %s1486_s22  ;;  %s1492_s22 = smov 32  }
 0x274   : > { %899 = vrot.lane.b32.xlu1 %v1820_v44, %s1482_s19 }
 0x278   : > { %901 = vrot.lane.b32.xlu1 %v1848_v59, %s1482_s19  ;;  %s1180_s19 = sld [smem:[#allocation2]] }
 0x27c   : > { %961 = vrot.lane.b32.xlu1 %v1820_v44, %s1489_s23 }
 0x280   : > { %963 = vrot.lane.b32.xlu1 %v1848_v59, %s1489_s23  ;;  %s1493_s23 = smov 16  }
 0x284   : > { %1023 = vrot.lane.b32.xlu1 %v1820_v44, %s1490_s24 }
 0x288   : > { %1025 = vrot.lane.b32.xlu1 %v1848_v59, %s1490_s24  ;;  %s1494_s24 = smov 112  }
 0x2a6   : > { %v655_v7 = vpop.permute.xlu1 %654  ;;  %v1895_v35 = vpop.permute.xlu0 %892 }
 0x2aa   : > { %v657_v11 = vpop.permute.xlu1 %656  ;;  %v664_v2 = vpop.permute.xlu0 %663 }
 0x2ab   : > { %v661_v46 = vsel %vm660_vm1, %v655_v7, %v657_v11  ;;  %v662_v48 = vsel %vm660_vm1, %v657_v11, %v655_v7  ;;  %v1319_v7 = vld [vmem:[%s2141_s6 + $0x2] ss:$8 sm:$0x3] }
 0x2ac   : > { %v681_v28 = vmul.f32 %v674_v40, %v662_v48  ;;  %v682_v4 = vmul.f32 %v678_v25, %v661_v46  ;;  %v849_v48 = vrot.slane %v1320_v58, %v1664_v32 }
 0x2ae   : > { %v720_v16 = vpop.permute.xlu1 %719  ;;  %v698_v46 = vrot.slane %v682_v4, %v1664_v32 }
 0x2b2   : > { %v722_v22 = vpop.permute.xlu1 %721 }
 0x2b3   : > { %v724_v56 = vsel %vm723_vm2, %v720_v16, %v722_v22  ;;  %v725_v57 = vsel %vm723_vm2, %v722_v22, %v720_v16 }
 0x2b4   : > { %v745_v16 = vmul.f32 %v738_v13, %v725_v57  ;;  %v746_v22 = vmul.f32 %v742_v6, %v724_v56  ;;  %v700_v56 = vmul.f32 %v698_v46, %v1866_v63 }
 0x2b6   : > { %v782_v24 = vpop.permute.xlu1 %781  ;;  %v760_v62 = vrot.slane %v746_v22, %v1664_v32 }
 0x2b8   : > { %v762_v22 = vmul.f32 %v760_v62, %v1872_v10 }
 0x2ba   : > { %v784_v20 = vpop.permute.xlu1 %783 }
 0x2be   : > { %v1880_v27 = vpop.permute.xlu1 %894 }
 0x2bf   : > { %v898_v62 = vsel %vm896_vm4, %v1880_v27, %v1895_v35 }
 0x2c2   : > { %v1884_v29 = vpop.permute.xlu1 %954 }
 0x2c6   : > { %v1888_v31 = vpop.permute.xlu1 %956 }
 0x2ca   : > { %v1893_v34 = vpop.permute.xlu1 %1016 }
 0x2ce   : > { %v1904_v39 = vpop.permute.xlu1 %1018 }
 0x2d2   : > { %v666_v53 = vpop.permute.xlu1 %665 }
 0x2d3   : > { %v667_v14 = vsel %vm660_vm1, %v664_v2, %v666_v53  ;;  %v668_v1 = vsel %vm660_vm1, %v666_v53, %v664_v2  ;;  %v800_v2 = vrot.slane %v1319_v7, %v1664_v32  ;;  %v804_v53 = vrot.slane %v1319_v7, %v1901_v38 }
 0x2d4   : > { %v683_v55 = vmul.f32 %v674_v40, %v668_v1  ;;  %v684_v18 = vmul.f32 %v678_v25, %v667_v14  ;;  %v694_v25 = vrot.slane %v681_v28, %v1664_v32  ;;  %v786_v14 = vsel %vm785_vm3, %v782_v24, %v784_v20 }
 0x2d5   : > { %v787_v28 = vsel %vm785_vm3, %v784_v20, %v782_v24  ;;  %v756_v7 = vrot.slane %v745_v16, %v1664_v32  ;;  %v858_v24 = vmul.f32 %v849_v48, %v1820_v44  ;;  %v808_v20 = vmul.f32 %v804_v53, %v786_v14 }
 0x2d6   : > { %v710_v11 = vrot.slane %v683_v55, %v1664_v32  ;;  %v714_v36 = vrot.slane %v684_v18, %v1664_v32  ;;  %v727_v40 = vpop.permute.xlu1 %726  ;;  %v699_v18 = vmul.f32 %v694_v25, %v1866_v63  ;;  %v1321_v63 = vld [vmem:[%s2141_s6 + $0x4] ss:$8 sm:$0x3]  ;;  %v859_v16 = vmul.f32 %v853_v49, %v1848_v59 }
 0x2d7   : > { %v761_v44 = vmul.f32 %v756_v7, %v1872_v10  ;;  %v911_v59 = vrot.slane %v1321_v63, %v1664_v32 }
 0x2d8   : > { %v715_v1 = vmul.f32 %v710_v11, %v705_v3  ;;  %v716_v4 = vmul.f32 %v714_v36, %v705_v3  ;;  %v807_v3 = vmul.f32 %v800_v2, %v787_v28 }
 0x2da   : > { %v729_v55 = vpop.permute.xlu1 %728  ;;  %v717_v11 = vadd.f32 %v715_v1, %v699_v18  ;;  %v718_v36 = vadd.f32 %v716_v4, %v700_v56  ;;  %v887_v1 = vrot.slane %v859_v16, %v1664_v32 }
 0x2db   : > { %v730_v57 = vsel %vm723_vm2, %v727_v40, %v729_v55  ;;  %v731_v58 = vsel %vm723_vm2, %v729_v55, %v727_v40 }
 0x2dc   : > { %v747_v61 = vmul.f32 %v738_v13, %v731_v58  ;;  %v748_v15 = vmul.f32 %v742_v6, %v730_v57  ;;  %v856_v13 = vmul.f32 %v849_v48, %v1810_v37  ;;  %v857_v6 = vmul.f32 %v853_v49, %v1818_v41 }
 0x2dd   : > { %v915_v37 = vrot.slane %v1321_v63, %v1901_v38  ;;  %v897_v41 = vsel %vm896_vm4, %v1895_v35, %v1880_v27  ;;  %v763_v10 = vadd.f32 %v761_v44, %v717_v11  ;;  %v883_v49 = vrot.slane %v858_v24, %v1664_v32 }
 0x2de   : > { %v772_v25 = vrot.slane %v747_v61, %v1664_v32  ;;  %v776_v40 = vrot.slane %v748_v15, %v1664_v32  ;;  %v789_v46 = vpop.permute.xlu1 %788  ;;  %v818_v61 = vrot.slane %v807_v3, %v1664_v32  ;;  %v822_v15 = vrot.slane %v808_v20, %v1664_v32 }
 0x2df   : > { %v867_v7 = vrot.slane %v856_v13, %v1664_v32  ;;  %v871_v27 = vrot.slane %v857_v6, %v1664_v32  ;;  %v918_v35 = vmul.f32 %v911_v59, %v897_v41  ;;  %v919_v3 = vmul.f32 %v915_v37, %v898_v62 }
 0x2e0   : > { %v777_v14 = vmul.f32 %v772_v25, %v1874_v17  ;;  %v778_v28 = vmul.f32 %v776_v40, %v1874_v17  ;;  %v764_v17 = vadd.f32 %v762_v22, %v718_v36  ;;  %v823_v24 = vmul.f32 %v818_v61, %v1876_v23 }
 0x2e1   : > { %v824_v20 = vmul.f32 %v822_v15, %v1876_v23  ;;  %v888_v25 = vmul.f32 %v883_v49, %v1868_v60  ;;  %v889_v13 = vmul.f32 %v887_v1, %v1868_v60  ;;  %v872_v23 = vmul.f32 %v867_v7, %v1882_v21 }
 0x2e2   : > { %v791_v48 = vpop.permute.xlu1 %790  ;;  %v779_v18 = vadd.f32 %v777_v14, %v763_v10  ;;  %v780_v56 = vadd.f32 %v778_v28, %v764_v17  ;;  %v929_v6 = vrot.slane %v918_v35, %v1664_v32  ;;  %v933_v44 = vrot.slane %v919_v3, %v1664_v32 }
 0x2e3   : > { %v792_v4 = vsel %vm785_vm3, %v789_v46, %v791_v48  ;;  %v793_v55 = vsel %vm785_vm3, %v791_v48, %v789_v46  ;;  %v873_v22 = vmul.f32 %v871_v27, %v1882_v21  ;;  %v959_v1 = vsel %vm958_vm5, %v1884_v29, %v1888_v31 }
 0x2e4   : > { %v809_v57 = vmul.f32 %v800_v2, %v793_v55  ;;  %v810_v58 = vmul.f32 %v804_v53, %v792_v4  ;;  %v1322_v2 = vld [vmem:[%s2141_s6 + $0x5] ss:$8 sm:$0x3]  ;;  %v825_v53 = vadd.f32 %v823_v24, %v779_v18  ;;  %v826_v40 = vadd.f32 %v824_v20, %v780_v56  ;;  %v986_v55 = vpop.permute.xlu0 %985 }
 0x2e5   : > { %v973_v15 = vrot.slane %v1322_v2, %v1664_v32  ;;  %v977_v41 = vrot.slane %v1322_v2, %v1901_v38  ;;  %v934_v21 = vmul.f32 %v929_v6, %v1870_v19  ;;  %v935_v49 = vmul.f32 %v933_v44, %v1870_v19 }
 0x2e6   : > { %v834_v63 = vrot.slane %v809_v57, %v1664_v32  ;;  %v838_v11 = vrot.slane %v810_v58, %v1664_v32  ;;  %v900_v36 = vpop.permute.xlu1 %899  ;;  %v960_v4 = vsel %vm958_vm5, %v1888_v31, %v1884_v29  ;;  %v1021_v3 = vsel %vm1020_vm6, %v1893_v34, %v1904_v39 }
 0x2e7   : > { %v980_v58 = vmul.f32 %v973_v15, %v959_v1  ;;  %v981_v7 = vmul.f32 %v977_v41, %v960_v4  ;;  %v1022_v24 = vsel %vm1020_vm6, %v1904_v39, %v1893_v34 }
 0x2e8   : > { %v839_v46 = vmul.f32 %v834_v63, %v1878_v26  ;;  %v840_v16 = vmul.f32 %v838_v11, %v1878_v26 }
 0x2e9   : > { %v991_v2 = vrot.slane %v980_v58, %v1664_v32 }
 0x2ea   : > { %v841_v14 = vadd.f32 %v839_v46, %v825_v53  ;;  %v842_v28 = vadd.f32 %v840_v16, %v826_v40  ;;  %v902_v61 = vpop.permute.xlu1 %901  ;;  %v995_v53 = vrot.slane %v981_v7, %v1664_v32 }
 0x2eb   : > { %v903_v60 = vsel %vm896_vm4, %v900_v36, %v902_v61  ;;  %v904_v26 = vsel %vm896_vm4, %v902_v61, %v900_v36  ;;  %v1002_v36 = vpop.permute.xlu0 %1001  ;;  %v996_v44 = vmul.f32 %v991_v2, %v986_v55 }
 0x2ec   : > { %v874_v62 = vadd.f32 %v872_v23, %v841_v14  ;;  %v875_v10 = vadd.f32 %v873_v22, %v842_v28  ;;  %v920_v17 = vmul.f32 %v911_v59, %v903_v60  ;;  %v921_v48 = vmul.f32 %v915_v37, %v904_v26  ;;  %v1323_v59 = vld [vmem:[%s2141_s6 + $0x6] ss:$8 sm:$0x3] }
 0x2ed   : > { %v1035_v29 = vrot.slane %v1323_v59, %v1664_v32  ;;  %v1039_v31 = vrot.slane %v1323_v59, %v1901_v38  ;;  %v997_v22 = vmul.f32 %v995_v53, %v986_v55 }
 0x2ee   : > { %v890_v37 = vadd.f32 %v888_v25, %v874_v62  ;;  %v891_v18 = vadd.f32 %v889_v13, %v875_v10  ;;  %v945_v56 = vrot.slane %v920_v17, %v1664_v32  ;;  %v949_v19 = vrot.slane %v921_v48, %v1664_v32  ;;  %v962_v57 = vpop.permute.xlu1 %961 }
 0x2ef   : > { %v1042_v16 = vmul.f32 %v1035_v29, %v1021_v3  ;;  %v1043_v34 = vmul.f32 %v1039_v31, %v1022_v24  ;;  %v1048_v61 = vpop.permute.xlu0 %1047 }
 0x2f0   : > { %v936_v27 = vadd.f32 %v934_v21, %v890_v37  ;;  %v937_v35 = vadd.f32 %v935_v49, %v891_v18  ;;  %v950_v20 = vmul.f32 %v945_v56, %v1886_v30  ;;  %v951_v63 = vmul.f32 %v949_v19, %v1886_v30 }
 0x2f1   : > { %v1053_v60 = vrot.slane %v1042_v16, %v1664_v32  ;;  %v1057_v26 = vrot.slane %v1043_v34, %v1664_v32 }
 0x2f2   : > { %v964_v11 = vpop.permute.xlu1 %963  ;;  %v952_v39 = vadd.f32 %v950_v20, %v936_v27  ;;  %v953_v13 = vadd.f32 %v951_v63, %v937_v35  ;;  %v1085_v20 = vld [vmem:[%s2142_s7] sm:$0xff]  ;;  %v1086_v63 = vld [vmem:[%s2142_s7 + $0x8] sm:$0xff] }
 0x2f3   : > { %v965_v25 = vsel %vm958_vm5, %v962_v57, %v964_v11  ;;  %v966_v38 = vsel %vm958_vm5, %v964_v11, %v962_v57  ;;  %v1064_v4 = vpop.permute.xlu0 %1063  ;;  %v1058_v55 = vmul.f32 %v1053_v60, %v1048_v61  ;;  %v1059_v59 = vmul.f32 %v1057_v26, %v1048_v61  ;;  %v1329_v61 = vld [vmem:[%s2142_s7 + $0x38] sm:$0xff] }
 0x2f4   : > { %v982_v40 = vmul.f32 %v973_v15, %v965_v25  ;;  %v983_v46 = vmul.f32 %v977_v41, %v966_v38  ;;  %v998_v41 = vadd.f32 %v996_v44, %v952_v39  ;;  %v999_v62 = vadd.f32 %v997_v22, %v953_v13 }
 0x2f6   : > { %v1007_v30 = vrot.slane %v982_v40, %v1664_v32  ;;  %v1011_v23 = vrot.slane %v983_v46, %v1664_v32  ;;  %v1024_v6 = vpop.permute.xlu1 %1023  ;;  %v1326_v40 = vld [vmem:[%s2142_s7 + $0x20] sm:$0xff]  ;;  %v1327_v46 = vld [vmem:[%s2142_s7 + $0x28] sm:$0xff] }
 0x2f8   : > { %v1012_v14 = vmul.f32 %v1007_v30, %v1002_v36  ;;  %v1013_v28 = vmul.f32 %v1011_v23, %v1002_v36 }
 0x2fa   : > { %v1026_v15 = vpop.permute.xlu1 %1025  ;;  %v1014_v49 = vadd.f32 %v1012_v14, %v998_v41  ;;  %v1015_v1 = vadd.f32 %v1013_v28, %v999_v62  ;;  %v1328_v28 = vld [vmem:[%s2142_s7 + $0x30] sm:$0xff]  ;;  %v1330_v62 = vld [vmem:[%s2142_s7 + $0x40] sm:$0xff] }
 0x2fb   : > { %v1027_v10 = vsel %vm1020_vm6, %v1024_v6, %v1026_v15  ;;  %v1028_v17 = vsel %vm1020_vm6, %v1026_v15, %v1024_v6 }
 0x2fc   : > { %v1044_v48 = vmul.f32 %v1035_v29, %v1027_v10  ;;  %v1045_v21 = vmul.f32 %v1039_v31, %v1028_v17  ;;  %v1060_v56 = vadd.f32 %v1058_v55, %v1014_v49  ;;  %v1061_v19 = vadd.f32 %v1059_v59, %v1015_v1  ;;  %v1324_v29 = vld [vmem:[%s2142_s7 + $0x10] sm:$0xff]  ;;  %v1325_v31 = vld [vmem:[%s2142_s7 + $0x18] sm:$0xff]  ;;  %v1331_v10 = vld [vmem:[%s2142_s7 + $0x48] sm:$0xff] }
 0x2fd   : > { %v1332_v1 = vld [vmem:[%s2142_s7 + $0x50] sm:$0xff] }
 0x2fe   : > { %v1069_v37 = vrot.slane %v1044_v48, %v1664_v32  ;;  %v1073_v18 = vrot.slane %v1045_v21, %v1664_v32 }
 0x300   : > { %v1074_v57 = vmul.f32 %v1069_v37, %v1064_v4  ;;  %v1075_v58 = vmul.f32 %v1073_v18, %v1064_v4  ;;  %v1333_v4 = vld [vmem:[%s2142_s7 + $0x58] sm:$0xff] }
 0x302   : > { %v1076_v7 = vadd.f32 %v1074_v57, %v1060_v56  ;;  %v1077_v27 = vadd.f32 %v1075_v58, %v1061_v19 }
 0x304   : > { %1080 = vrot.lane.b32.xlu1 %v1077_v27, %s1491_s21  ;;  %1078 = vrot.lane.b32.xlu0 %v1076_v7, %s1491_s21  ;;  %v1123_v21 = vmul.f32 %v1329_v61, %v1077_v27  ;;  %v1122_v49 = vmul.f32 %v1328_v28, %v1076_v7  ;;  %v1185_v28 = vstv %s1336_s20 }
 0x308   : > { %1093 = vrot.lane.b32.xlu1 %v1077_v27, %s1492_s22  ;;  %1091 = vrot.lane.b32.xlu0 %v1076_v7, %s1492_s22 }
 0x30c   : > { %1107 = vrot.lane.b32.xlu1 %v1077_v27, %s1493_s23  ;;  %1105 = vrot.lane.b32.xlu0 %v1076_v7, %s1493_s23  ;;  %s2098_s23 = scalar_lea.vmem %s2144_s9, %s1341_s17 }
 0x310   : > { %1128 = vrot.lane.b32.xlu1 %v1077_v27, %s1494_s24  ;;  %1126 = vrot.lane.b32.xlu0 %v1076_v7, %s1494_s24 }
 0x314   : > { %1142 = vrot.lane.b32.xlu1 %v1077_v27, %s1495_s25  ;;  %1140 = vrot.lane.b32.xlu0 %v1076_v7, %s1495_s25 }
 0x318   : > { %1156 = vrot.lane.b32.xlu1 %v1077_v27, %s1496_s26  ;;  %1154 = vrot.lane.b32.xlu0 %v1076_v7, %s1496_s26 }
 0x376   : > { %v1081_v32 = vpop.permute.xlu1 %1080  ;;  %v1079_v35 = vpop.permute.xlu0 %1078 }
 0x377   : > { %v1083_v11 = vsel %vm1082_vm7, %v1079_v35, %v1081_v32  ;;  %v1084_v36 = vsel %vm1082_vm7, %v1081_v32, %v1079_v35  ;;  %v1334_v32 = vld [vmem:[%s2142_s7 + $0x60] sm:$0xff]  ;;  %v1335_v35 = vld [vmem:[%s2142_s7 + $0x68] sm:$0xff] }
 0x378   : > { %v1087_v16 = vmul.f32 %v1085_v20, %v1084_v36  ;;  %v1088_v34 = vmul.f32 %v1086_v63, %v1083_v11 }
 0x37a   : > { %v1094_v3 = vpop.permute.xlu1 %1093  ;;  %v1092_v24 = vpop.permute.xlu0 %1091 }
 0x37b   : > { %v1096_v25 = vsel %vm1095_vm8, %v1092_v24, %v1094_v3  ;;  %v1097_v38 = vsel %vm1095_vm8, %v1094_v3, %v1092_v24 }
 0x37c   : > { %v1101_v2 = vmul.f32 %v1324_v29, %v1097_v38  ;;  %v1102_v53 = vmul.f32 %v1325_v31, %v1096_v25 }
 0x37e   : > { %v1108_v39 = vpop.permute.xlu1 %1107  ;;  %v1106_v13 = vpop.permute.xlu0 %1105  ;;  %v1103_v6 = vadd.f32 %v1101_v2, %v1087_v16  ;;  %v1104_v44 = vadd.f32 %v1102_v53, %v1088_v34 }
 0x37f   : > { %v1110_v30 = vsel %vm1109_vm9, %v1106_v13, %v1108_v39  ;;  %v1111_v23 = vsel %vm1109_vm9, %v1108_v39, %v1106_v13 }
 0x380   : > { %v1115_v22 = vmul.f32 %v1326_v40, %v1111_v23  ;;  %v1116_v14 = vmul.f32 %v1327_v46, %v1110_v30 }
 0x382   : > { %v1117_v60 = vadd.f32 %v1115_v22, %v1103_v6  ;;  %v1118_v26 = vadd.f32 %v1116_v14, %v1104_v44  ;;  %v1129_v15 = vpop.permute.xlu1 %1128  ;;  %v1127_v41 = vpop.permute.xlu0 %1126  ;;  %v1181_v44 = vstv %s1180_s19 }
 0x383   : > { %v1131_v17 = vsel %vm1130_vm10, %v1127_v41, %v1129_v15  ;;  %v1132_v48 = vsel %vm1130_vm10, %v1129_v15, %v1127_v41 }
 0x384   : > { %v1125_v55 = vadd.f32 %v1123_v21, %v1118_v26  ;;  %v1124_v59 = vadd.f32 %v1122_v49, %v1117_v60  ;;  %v1136_v37 = vmul.f32 %v1330_v62, %v1131_v17  ;;  %v1137_v18 = vmul.f32 %v1331_v10, %v1132_v48 }
 0x386   : > { %v1143_v56 = vpop.permute.xlu1 %1142  ;;  %v1141_v19 = vpop.permute.xlu0 %1140  ;;  %v1138_v29 = vadd.f32 %v1136_v37, %v1124_v59  ;;  %v1139_v31 = vadd.f32 %v1137_v18, %v1125_v55 }
 0x387   : > { %v1145_v57 = vsel %vm1144_vm11, %v1141_v19, %v1143_v56  ;;  %v1146_v58 = vsel %vm1144_vm11, %v1143_v56, %v1141_v19 }
 0x388   : > { %v1150_v27 = vmul.f32 %v1332_v1, %v1145_v57  ;;  %v1151_v7 = vmul.f32 %v1333_v4, %v1146_v58 }
 0x38a   : > { %v1157_v3 = vpop.permute.xlu1 %1156  ;;  %v1155_v24 = vpop.permute.xlu0 %1154  ;;  %v1152_v11 = vadd.f32 %v1150_v27, %v1138_v29  ;;  %v1153_v36 = vadd.f32 %v1151_v7, %v1139_v31 }
 0x38b   : > { %v1159_v20 = vsel %vm1158_vm12, %v1155_v24, %v1157_v3  ;;  %v1160_v63 = vsel %vm1158_vm12, %v1157_v3, %v1155_v24 }
 0x38c   : > { %v1164_v25 = vmul.f32 %v1334_v32, %v1159_v20  ;;  %v1165_v38 = vmul.f32 %v1335_v35, %v1160_v63 }
 0x38e   : > { %v1166_v2 = vadd.f32 %v1164_v25, %v1152_v11  ;;  %v1167_v33 = vadd.f32 %v1165_v38, %v1153_v36 }
 0x390   : > { %v1168_v53 = vrot.slane %v1166_v2, 4  ;;  %v1174_v40 = vrot.slane %v1167_v33, 4 }
 0x392   : > { %v1169_v46 = vadd.f32 %v1168_v53, %v1166_v2  ;;  %v1175_v16 = vadd.f32 %v1174_v40, %v1167_v33 }
 0x394   : > { %v1170_v34 = vrot.slane %v1169_v46, 2  ;;  %v1176_v39 = vrot.slane %v1175_v16, 2 }
 0x396   : > { %v1171_v13 = vadd.f32 %v1170_v34, %v1169_v46  ;;  %v1177_v30 = vadd.f32 %v1176_v39, %v1175_v16 }
 0x398   : > { %v1172_v23 = vrot.slane %v1171_v13, 1  ;;  %v1178_v6 = vrot.slane %v1177_v30, 1 }
 0x39a   : > { %v1173_v22 = vadd.f32 %v1172_v23, %v1171_v13  ;;  %v1179_v14 = vadd.f32 %v1178_v6, %v1177_v30 }
 0x39c   : > { %v1182_v61 = vmul.f32 %v1181_v44, %v1173_v22  ;;  %v1183_v60 = vmul.f32 %v1181_v44, %v1179_v14 }
 0x39e   : > { %v1186_v26 = vadd.f32 %v1185_v28, %v1182_v61  ;;  %v1187_v15 = vadd.f32 %v1185_v28, %v1183_v60 }
 0x3a0   : > { %v1337_v41 = vmul.f32 -1.442695, %v1186_v26  ;;  %v1338_v62 = vmul.f32 -1.442695, %v1187_v15 }
 0x3a2   : > { %1435 = vpow2.f32 %v1337_v41 }
 0x3a3   : > { %1437 = vpow2.f32 %v1338_v62 }
 0x3ac   : > { %v1436_v10 = vpop.eup %1435 }
 0x3ad   : > { %v1438_v17 = vpop.eup %1437  ;;  %v1194_v48 = vadd.f32 1.0, %v1436_v10 }
 0x3ae   : > { %v1195_v21 = vadd.f32 1.0, %v1438_v17 }
 0x3af   : > { %1439 = vrcp.f32 %v1194_v48 }
 0x3b0   : > { %1441 = vrcp.f32 %v1195_v21 }
 0x3b9   : > { %v1440_v49 = vpop.eup %1439 }
 0x3ba   : > { %v1442_v1 = vpop.eup %1441  ;;  %v1200_v4 = vmul.f32 %v1440_v49, %v1742_v43  ;;  %v1202_v55 = vmul.f32 %v1440_v49, %v1739_v42  ;;  %v1204_v59 = vmul.f32 %v1440_v49, %v1745_v45  ;;  %v1206_v37 = vmul.f32 %v1440_v49, %v1750_v47 }
 0x3bb   : > { %v1201_v18 = vmul.f32 %v1442_v1, %v1767_v8  ;;  %v1203_v56 = vmul.f32 %v1442_v1, %v1773_v12  ;;  %v1205_v19 = vmul.f32 %v1442_v1, %v1757_v5  ;;  %v1207_v57 = vmul.f32 %v1442_v1, %v1760_v0  ;;  %v2152_v5 = vld [vmem:[#allocation5_spill] sm:$0xff]  ;;  %v2153_v8 = vld [vmem:[#allocation6_spill] sm:$0xff]  ;;  %v2154_v12 = vld [vmem:[#allocation7_spill] sm:$0xff] }
 0x3bc   : > { %v1208_v43 = vmul.f32 %v1440_v49, %v1754_v50  ;;  %v1209_v42 = vmul.f32 %v1442_v1, %v1770_v52  ;;  %v1210_v45 = vmul.f32 %v1440_v49, %v1764_v51  ;;  %v1211_v47 = vmul.f32 %v1442_v1, %v1777_v9  ;;  %1216 = vst [vmem:[%s2098_s23] sm:$0xff] %v1200_v4 }
 0x3bd   : > { %1218 = vst [vmem:[%s2098_s23 + $0x10] sm:$0xff] %v1202_v55  ;;  %1220 = vst [vmem:[%s2098_s23 + $0x20] sm:$0xff] %v1204_v59  ;;  %v1212_v50 = vmul.f32 %v1440_v49, %v1780_v54  ;;  %v1213_v0 = vmul.f32 %v1442_v1, %v2152_v5  ;;  %v1214_v52 = vmul.f32 %v1440_v49, %v2153_v8 }
 0x3be   : > { %1222 = vst [vmem:[%s2098_s23 + $0x30] sm:$0xff] %v1206_v37  ;;  %v1215_v51 = vmul.f32 %v1442_v1, %v2154_v12  ;;  %1217 = vst [vmem:[%s2098_s23 + $0x8] sm:$0xff] %v1201_v18 }
 0x3bf   : > { %1219 = vst [vmem:[%s2098_s23 + $0x18] sm:$0xff] %v1203_v56  ;;  %1221 = vst [vmem:[%s2098_s23 + $0x28] sm:$0xff] %v1205_v19 }
 0x3c0   : > { %1223 = vst [vmem:[%s2098_s23 + $0x38] sm:$0xff] %v1207_v57  ;;  %1224 = vst [vmem:[%s2098_s23 + $0x40] sm:$0xff] %v1208_v43 }
 0x3c1   : > { %1225 = vst [vmem:[%s2098_s23 + $0x48] sm:$0xff] %v1209_v42  ;;  %1226 = vst [vmem:[%s2098_s23 + $0x50] sm:$0xff] %v1210_v45 }
 0x3c2   : > { %1227 = vst [vmem:[%s2098_s23 + $0x58] sm:$0xff] %v1211_v47  ;;  %1228 = vst [vmem:[%s2098_s23 + $0x60] sm:$0xff] %v1212_v50 }
 0x3c3   : > { %1229 = vst [vmem:[%s2098_s23 + $0x68] sm:$0xff] %v1213_v0  ;;  %1230 = vst [vmem:[%s2098_s23 + $0x70] sm:$0xff] %v1214_v52 }
 0x3c4   : > { %1231 = vst [vmem:[%s2098_s23 + $0x78] sm:$0xff] %v1215_v51 }
 0x3c5 PF: > { %s20_s30 = sadd.s32 1, %s1468_s30  }
 0x3c6   : > { %p17_p1 = scmp.ge.s32.totalorder %s20_s30, 4  }
 0x3c8   :  { %19 = sbr.rel (!%p17_p1) target bundleno = 1 (0x1), region = 103 }
 0x3cf   :  { %1253 = vsyncpa [#allocation3], 1 }
 0x3d0   :  { %1255 = vsyncpa [#allocation3 + $0x1], 1 }

</bundles_post_ra>
